<compile_context>
chip_gen: v7x
topology: tpu7x:2x2x1
jax: 0.10.0
libtpu: 0.0.40
codegen_flags: <defaults>
</compile_context>

<pallas_src>
import math

import jax
import jax.numpy as jnp
from jax.experimental import pallas as pl
from jax.experimental.pallas import tpu as pltpu


# ----------------------------------------------------------------------------
# Helpers
# ----------------------------------------------------------------------------
def _itemsize(dtype):
    return jnp.dtype(dtype).itemsize


def _vmem_limit(need_bytes):
    """Scoped-VMEM request: actual block/scratch totals with headroom.
    TODO(synk): generation-specific ceiling (128 MiB v5e/v6e, 64 MiB v7x)."""
    return int(min(max(2 * need_bytes + (4 << 20), 16 << 20), 96 << 20))


def _pick_time_chunk(T, B, max_chunk=32):
    """Pick time-chunk Tc and padded length T_pad.

    Guarantees either a single chunk (row block == full extent) or (Tc*B) % 8 == 0
    (sublane-aligned row blocks).  Awkward T is padded+masked instead of silently
    degrading to Tc=1.
    """
    if T <= max_chunk:
        return T, T
    req = 8 // math.gcd(B, 8)                 # Tc multiple needed so (Tc*B) % 8 == 0
    for tc in range(max_chunk, 7, -1):        # prefer an exact divisor >= 8 (no padding)
        if tc % req == 0 and T % tc == 0:
            return tc, T
    tc = max((max_chunk // req) * req, req)   # fallback: pad + mask
    t_pad = ((T + tc - 1) // tc) * tc
    return tc, t_pad


# ----------------------------------------------------------------------------
# Fused bidirectional LSTM layer: per grid step (one time chunk):
#   1. hoisted input projection  gx_dir = sum_p x_part_p @ W_ih_part_p + b   (MXU)
#   2. serial recurrence over the chunk, two independent per-direction chains
#      (two (B,H)x(H,4H) MXU matmuls per step, no concat, no cross-direction waste)
#   3. per-chunk y_fwd / y_rev output blocks (pipelined), final (h,c) on last chunk.
# ----------------------------------------------------------------------------
def _make_bilstm_kernel(P, Tc, B, H, T, T_pad, out_dtype, need_mask):
    def kernel(*refs):
        i = 0
        xf = refs[i:i + P]; i += P            # forward-ordered input chunk(s)
        xr = refs[i:i + P]; i += P            # reverse-ordered input chunk(s)
        wf = refs[i:i + P]; i += P            # fwd-direction input weights (Din_p, 4H) bf16
        wr = refs[i:i + P]; i += P            # rev-direction input weights
        whh_f_ref, whh_r_ref, b_f_ref, b_r_ref = refs[i:i + 4]; i += 4
        yf_ref, yr_ref, hf_ref, hr_ref, cf_ref, cr_ref = refs[i:i + 6]; i += 6
        gxf_s, gxr_s, hf_s, cf_s, hr_s, cr_s = refs[i:i + 6]

        c_idx = pl.program_id(0)

        @pl.when(c_idx == 0)
        def _():
            hf_s[...] = jnp.zeros_like(hf_s)
            cf_s[...] = jnp.zeros_like(cf_s)
            hr_s[...] = jnp.zeros_like(hr_s)
            cr_s[...] = jnp.zeros_like(cr_s)

        # ---- hoisted per-chunk input projection (bias folded in), stored to VMEM scratch
        def proj(x_refs, w_refs, b_ref, out_s):
            acc = jnp.dot(x_refs[0][...].astype(jnp.bfloat16), w_refs[0][...],
                          preferred_element_type=jnp.float32)
            for p in range(1, P):
                acc = acc + jnp.dot(x_refs[p][...].astype(jnp.bfloat16), w_refs[p][...],
                                    preferred_element_type=jnp.float32)
            out_s[...] = acc + b_ref[...]

        proj(xf, wf, b_f_ref, gxf_s)          # (Tc*B, 4H) f32, forward direction
        proj(xr, wr, b_r_ref, gxr_s)          # (Tc*B, 4H) f32, reverse direction

        w_hh_f = whh_f_ref[...]               # (H, 4H) bf16, loop-invariant
        w_hh_r = whh_r_ref[...]

        # TODO(synk): gate activations could run in bf16 on v6e/v7x (v5e lacks bf16 VPU/EUP).
        def cell(g, h, c, w_hh):
            gates = jnp.dot(h.astype(jnp.bfloat16), w_hh,
                            preferred_element_type=jnp.float32) + g
            i_g = jax.nn.sigmoid(gates[:, 0 * H:1 * H])
            f_g = jax.nn.sigmoid(gates[:, 1 * H:2 * H])
            g_g = jnp.tanh(gates[:, 2 * H:3 * H])
            o_g = jax.nn.sigmoid(gates[:, 3 * H:4 * H])
            c_new = f_g * c + i_g * g_g
            h_new = o_g * jnp.tanh(c_new)
            return h_new, c_new

        h_f, c_f = hf_s[...], cf_s[...]
        h_r, c_r = hr_s[...], cr_s[...]

        for s in range(Tc):                   # static unroll: all slice offsets are static
            lo_f = s * B                      # forward local time s        -> global c*Tc+s
            lo_r = (Tc - 1 - s) * B           # reverse local time Tc-1-s   -> global T_pad-1-(c*Tc+s)

            # two independent per-direction chains
            h_f_n, c_f_n = cell(gxf_s[lo_f:lo_f + B, :], h_f, c_f, w_hh_f)
            h_r_n, c_r_n = cell(gxr_s[lo_r:lo_r + B, :], h_r, c_r, w_hh_r)

            if need_mask:                     # padded steps keep the carried state unchanged
                t = c_idx * Tc + s
                mf = (t < T).astype(jnp.float32)
                mr = (t >= (T_pad - T)).astype(jnp.float32)
                h_f_n = mf * h_f_n + (1.0 - mf) * h_f
                c_f_n = mf * c_f_n + (1.0 - mf) * c_f
                h_r_n = mr * h_r_n + (1.0 - mr) * h_r
                c_r_n = mr * c_r_n + (1.0 - mr) * c_r

            yf_ref[lo_f:lo_f + B, :] = h_f_n.astype(out_dtype)
            yr_ref[lo_r:lo_r + B, :] = h_r_n.astype(out_dtype)
            h_f, c_f, h_r, c_r = h_f_n, c_f_n, h_r_n, c_r_n

        hf_s[...] = h_f
        cf_s[...] = c_f
        hr_s[...] = h_r
        cr_s[...] = c_r

        @pl.when(c_idx == pl.num_programs(0) - 1)
        def _():
            hf_ref[...] = h_f
            hr_ref[...] = h_r
            cf_ref[...] = c_f
            cr_ref[...] = c_r

    return kernel


def bilstm_layer(x_parts, wih_f_parts, wih_r_parts, whh_f, whh_r, b_f, b_r,
                 *, T, T_pad, Tc, B, H, need_mask, out_dtype):
    """x_parts: tuple of (T_pad*B, Din_p) bf16 arrays (rows ordered time-major).
    Returns y_fwd, y_rev (T_pad*B, H) out_dtype and per-direction (h, c) (B, H) f32."""
    P = len(x_parts)
    G = 4 * H
    num_chunks = T_pad // Tc
    rows = Tc * B

    def fwd_map(c):
        return (c, 0)

    def rev_map(c):
        return (num_chunks - 1 - c, 0)

    def const_map(c):
        return (0, 0)

    in_specs = (
        [pl.BlockSpec((rows, p.shape[-1]), fwd_map) for p in x_parts]
        + [pl.BlockSpec((rows, p.shape[-1]), rev_map) for p in x_parts]
        + [pl.BlockSpec(w.shape, const_map) for w in wih_f_parts]
        + [pl.BlockSpec(w.shape, const_map) for w in wih_r_parts]
        + [pl.BlockSpec(whh_f.shape, const_map),
           pl.BlockSpec(whh_r.shape, const_map),
           pl.BlockSpec(b_f.shape, const_map),
           pl.BlockSpec(b_r.shape, const_map)]
    )
    out_shape = (
        jax.ShapeDtypeStruct((T_pad * B, H), out_dtype),   # y forward half
        jax.ShapeDtypeStruct((T_pad * B, H), out_dtype),   # y reverse half
        jax.ShapeDtypeStruct((B, H), jnp.float32),         # h_n fwd
        jax.ShapeDtypeStruct((B, H), jnp.float32),         # h_n rev
        jax.ShapeDtypeStruct((B, H), jnp.float32),         # c_n fwd
        jax.ShapeDtypeStruct((B, H), jnp.float32),         # c_n rev
    )
    out_specs = (
        pl.BlockSpec((rows, H), fwd_map),
        pl.BlockSpec((rows, H), rev_map),
        pl.BlockSpec((B, H), const_map),
        pl.BlockSpec((B, H), const_map),
        pl.BlockSpec((B, H), const_map),
        pl.BlockSpec((B, H), const_map),
    )
    scratch_shapes = [
        pltpu.VMEM((rows, G), jnp.float32),   # gx forward (chunk)
        pltpu.VMEM((rows, G), jnp.float32),   # gx reverse (chunk)
        pltpu.VMEM((B, H), jnp.float32),      # h fwd carry
        pltpu.VMEM((B, H), jnp.float32),      # c fwd carry
        pltpu.VMEM((B, H), jnp.float32),      # h rev carry
        pltpu.VMEM((B, H), jnp.float32),      # c rev carry
    ]

    # VMEM budget: double-buffered in/out blocks + resident weights + scratch, with headroom.
    need = 0
    for p in x_parts:
        need += 2 * 2 * rows * p.shape[-1] * _itemsize(p.dtype)
    for w in (*wih_f_parts, *wih_r_parts, whh_f, whh_r):
        need += 2 * int(math.prod(w.shape)) * _itemsize(w.dtype)
    need += 2 * 2 * int(math.prod(b_f.shape)) * _itemsize(b_f.dtype)
    need += 2 * 2 * rows * H * _itemsize(out_dtype)
    need += (2 * 4 + 4) * B * H * 4
    need += 2 * rows * G * 4

    kernel = _make_bilstm_kernel(P, Tc, B, H, T, T_pad, out_dtype, need_mask)

    return pl.pallas_call(
        kernel,
        out_shape=out_shape,
        grid_spec=pltpu.PrefetchScalarGridSpec(
            num_scalar_prefetch=0,
            grid=(num_chunks,),
            in_specs=in_specs,
            out_specs=out_specs,
            scratch_shapes=scratch_shapes),
        compiler_params=pltpu.CompilerParams(
            dimension_semantics=("arbitrary",),
            vmem_limit_bytes=_vmem_limit(need)),
    )(*x_parts, *x_parts, *wih_f_parts, *wih_r_parts, whh_f, whh_r, b_f, b_r)


# ----------------------------------------------------------------------------
# Mean over the batch dim (torch.mean(output, dim=1).unsqueeze(1)), tiled over T,
# "parallel" grid axis, lane-dense [mean_fwd | mean_rev] output.
# ----------------------------------------------------------------------------
def _batch_mean_kernel(yf_ref, yr_ref, o_ref):
    H = yf_ref.shape[-1]
    o_ref[:, :, 0:H] = jnp.mean(yf_ref[...], axis=1, keepdims=True)
    o_ref[:, :, H:2 * H] = jnp.mean(yr_ref[...], axis=1, keepdims=True)


def batch_mean(yf2d, yr2d, *, T_pad, B, H, Tm):
    yf = yf2d.reshape(T_pad, B, H)
    yr = yr2d.reshape(T_pad, B, H)
    num = T_pad // Tm
    need = 2 * 2 * Tm * B * H * 4 + 2 * Tm * 2 * H * 4
    return pl.pallas_call(
        _batch_mean_kernel,
        out_shape=jax.ShapeDtypeStruct((T_pad, 1, 2 * H), jnp.float32),
        grid_spec=pltpu.PrefetchScalarGridSpec(
            num_scalar_prefetch=0,
            grid=(num,),
            in_specs=[pl.BlockSpec((Tm, B, H), lambda i: (i, 0, 0)),
                      pl.BlockSpec((Tm, B, H), lambda i: (i, 0, 0))],
            out_specs=pl.BlockSpec((Tm, 1, 2 * H), lambda i: (i, 0, 0))),
        compiler_params=pltpu.CompilerParams(
            dimension_semantics=("parallel",),
            vmem_limit_bytes=_vmem_limit(need)),
    )(yf, yr)


# ----------------------------------------------------------------------------
# Module wrapper: parameters pre-transposed / per-direction / split for the
# two-part (y_fwd, y_rev) input of layers >= 1.
# ----------------------------------------------------------------------------
class SentenceRepresentation:
    def __init__(self, input_size, hidden_size, num_layers, attention, key):
        assert not attention, "CausalSelfAttention not available"  # TODO(synk): external class undefined
        self.input_size = input_size
        self.hidden = hidden_size
        self.num_layers = num_layers

        k = 1.0 / math.sqrt(hidden_size)
        G = 4 * hidden_size
        self.layers = []
        for layer in range(num_layers):
            in_dim = input_size if layer == 0 else 2 * hidden_size
            dirs = []
            for _d in range(2):  # forward, reverse (PyTorch gate order [i, f, g, o])
                key, k1, k2, k3, k4 = jax.random.split(key, 5)
                w_ih = jax.random.uniform(k1, (G, in_dim), jnp.float32, -k, k)
                w_hh = jax.random.uniform(k2, (G, hidden_size), jnp.float32, -k, k)
                b_ih = jax.random.uniform(k3, (G,), jnp.float32, -k, k)
                b_hh = jax.random.uniform(k4, (G,), jnp.float32, -k, k)
                wihT = w_ih.T.astype(jnp.bfloat16)             # (in_dim, 4H) pre-transposed
                if layer == 0:
                    wih_parts = (wihT,)
                else:
                    # split along the input-feature dim so the next layer consumes
                    # y_fwd / y_rev separately (no HBM re-concatenation between layers)
                    wih_parts = (wihT[:hidden_size, :], wihT[hidden_size:, :])
                dirs.append(dict(
                    wih_parts=wih_parts,
                    whhT=w_hh.T.astype(jnp.bfloat16),          # (H, 4H) pre-transposed
                    b=(b_ih + b_hh).reshape(1, G).astype(jnp.float32),
                ))
            self.layers.append(tuple(dirs))

    def __call__(self, input_x):
        # input_x: (T, B, input_size)
        x = input_x.astype(jnp.float32)
        T, B, _ = x.shape
        H = self.hidden
        Tc, T_pad = _pick_time_chunk(T, B)
        need_mask = (T_pad != T)

        x0 = x.astype(jnp.bfloat16)
        if need_mask:
            x0 = jnp.pad(x0, ((0, T_pad - T), (0, 0), (0, 0)))
        x_parts = (x0.reshape(T_pad * B, self.input_size),)

        n_layers = len(self.layers)
        h_list, c_list = [], []
        for li, (fwd, rev) in enumerate(self.layers):
            out_dtype = jnp.float32 if li == n_layers - 1 else jnp.bfloat16
            yf, yr, h_f, h_r, c_f, c_r = bilstm_layer(
                x_parts, fwd["wih_parts"], rev["wih_parts"],
                fwd["whhT"], rev["whhT"], fwd["b"], rev["b"],
                T=T, T_pad=T_pad, Tc=Tc, B=B, H=H,
                need_mask=need_mask, out_dtype=out_dtype)
            x_parts = (yf, yr)                         # bf16 handoff to next layer
            h_list += [h_f, h_r]                       # [fwd, rev] per layer (PyTorch order)
            c_list += [c_f, c_r]

        h_n = jnp.stack(h_list, axis=0)                # (num_layers*2, B, H)
        c_n = jnp.stack(c_list, axis=0)

        output_mean = batch_mean(x_parts[0], x_parts[1],
                                 T_pad=T_pad, B=B, H=H, Tm=Tc)[:T]   # (T, 1, 2H)
        return output_mean, (h_n, c_n)


if __name__ == "__main__":
    key = jax.random.PRNGKey(0)
    key, k_in, k_p = jax.random.split(key, 3)

    seq_len, batch, input_size, hidden_size, num_layers = 8, 2, 16, 32, 2
    x = jax.random.normal(k_in, (seq_len, batch, input_size), jnp.float32)

    model = SentenceRepresentation(input_size, hidden_size, num_layers,
                                   attention=False, key=k_p)
    out_mean, (h_n, c_n) = model(x)
    jax.block_until_ready((out_mean, h_n, c_n))

    assert out_mean.shape == (seq_len, 1, 2 * hidden_size)
    assert h_n.shape == (num_layers * 2, batch, hidden_size)
    assert c_n.shape == (num_layers * 2, batch, hidden_size)
    print("KERNEL_OK")
</pallas_src>

<mosaic_0001>
module attributes {stable_mosaic.version = 11 : i64} {
  func.func @kernel(%arg0: i32, %arg1: memref<16x16xbf16, #tpu.memory_space<vmem>>, %arg2: memref<16x16xbf16, #tpu.memory_space<vmem>>, %arg3: memref<16x128xbf16, #tpu.memory_space<vmem>>, %arg4: memref<16x128xbf16, #tpu.memory_space<vmem>>, %arg5: memref<32x128xbf16, #tpu.memory_space<vmem>>, %arg6: memref<32x128xbf16, #tpu.memory_space<vmem>>, %arg7: memref<1x128xf32, #tpu.memory_space<vmem>>, %arg8: memref<1x128xf32, #tpu.memory_space<vmem>>, %arg9: memref<16x32xbf16, #tpu.memory_space<vmem>>, %arg10: memref<16x32xbf16, #tpu.memory_space<vmem>>, %arg11: memref<2x32xf32, #tpu.memory_space<vmem>>, %arg12: memref<2x32xf32, #tpu.memory_space<vmem>>, %arg13: memref<2x32xf32, #tpu.memory_space<vmem>>, %arg14: memref<2x32xf32, #tpu.memory_space<vmem>>, %arg15: memref<16x128xf32, #tpu.memory_space<vmem>>, %arg16: memref<16x128xf32, #tpu.memory_space<vmem>>, %arg17: memref<2x32xf32, #tpu.memory_space<vmem>>, %arg18: memref<2x32xf32, #tpu.memory_space<vmem>>, %arg19: memref<2x32xf32, #tpu.memory_space<vmem>>, %arg20: memref<2x32xf32, #tpu.memory_space<vmem>>) attributes {dimension_semantics = [#tpu.dimension_semantics<arbitrary>], iteration_bounds = array<i64: 1>, scalar_prefetch = 0 : i64, scratch_operands = 6 : i64, tpu.core_type = #tpu.core_type<tc>, window_params = [{transform_indices = @transform_0, window_bounds = array<i64: 16, 16>}, {transform_indices = @transform_1, window_bounds = array<i64: 16, 16>}, {pipeline_mode = #tpu.pipeline_mode<synchronous>, transform_indices = @transform_2, window_bounds = array<i64: 16, 128>}, {pipeline_mode = #tpu.pipeline_mode<synchronous>, transform_indices = @transform_3, window_bounds = array<i64: 16, 128>}, {pipeline_mode = #tpu.pipeline_mode<synchronous>, transform_indices = @transform_4, window_bounds = array<i64: 32, 128>}, {pipeline_mode = #tpu.pipeline_mode<synchronous>, transform_indices = @transform_5, window_bounds = array<i64: 32, 128>}, {pipeline_mode = #tpu.pipeline_mode<synchronous>, transform_indices = @transform_6, window_bounds = array<i64: 1, 128>}, {pipeline_mode = #tpu.pipeline_mode<synchronous>, transform_indices = @transform_7, window_bounds = array<i64: 1, 128>}, {transform_indices = @transform_8, window_bounds = array<i64: 16, 32>}, {transform_indices = @transform_9, window_bounds = array<i64: 16, 32>}, {pipeline_mode = #tpu.pipeline_mode<synchronous>, transform_indices = @transform_10, window_bounds = array<i64: 2, 32>}, {pipeline_mode = #tpu.pipeline_mode<synchronous>, transform_indices = @transform_11, window_bounds = array<i64: 2, 32>}, {pipeline_mode = #tpu.pipeline_mode<synchronous>, transform_indices = @transform_12, window_bounds = array<i64: 2, 32>}, {pipeline_mode = #tpu.pipeline_mode<synchronous>, transform_indices = @transform_13, window_bounds = array<i64: 2, 32>}]} {
    %c0_i32 = arith.constant 0 : i32
    %0 = arith.cmpi eq, %arg0, %c0_i32 : i32
    %1 = arith.extui %0 : i1 to i32
    %c0_i32_0 = arith.constant 0 : i32
    %2 = arith.cmpi ne, %1, %c0_i32_0 : i32
    scf.if %2 {
      %cst_160 = arith.constant 0.000000e+00 : f32
      %526 = vector.broadcast %cst_160 : f32 to vector<2x32xf32>
      %c0_161 = arith.constant 0 : index
      %c0_162 = arith.constant 0 : index
      %527 = vector.load %arg17[%c0_161, %c0_162] : memref<2x32xf32, #tpu.memory_space<vmem>>, vector<2x32xf32>
      tpu.vector_store %arg17[%c0_161, %c0_162], %526 {strides = array<i32>} : memref<2x32xf32, #tpu.memory_space<vmem>>, vector<2x32xf32>,
      %cst_163 = arith.constant 0.000000e+00 : f32
      %528 = vector.broadcast %cst_163 : f32 to vector<2x32xf32>
      %c0_164 = arith.constant 0 : index
      %c0_165 = arith.constant 0 : index
      %529 = vector.load %arg18[%c0_164, %c0_165] : memref<2x32xf32, #tpu.memory_space<vmem>>, vector<2x32xf32>
      tpu.vector_store %arg18[%c0_164, %c0_165], %528 {strides = array<i32>} : memref<2x32xf32, #tpu.memory_space<vmem>>, vector<2x32xf32>,
      %cst_166 = arith.constant 0.000000e+00 : f32
      %530 = vector.broadcast %cst_166 : f32 to vector<2x32xf32>
      %c0_167 = arith.constant 0 : index
      %c0_168 = arith.constant 0 : index
      %531 = vector.load %arg19[%c0_167, %c0_168] : memref<2x32xf32, #tpu.memory_space<vmem>>, vector<2x32xf32>
      tpu.vector_store %arg19[%c0_167, %c0_168], %530 {strides = array<i32>} : memref<2x32xf32, #tpu.memory_space<vmem>>, vector<2x32xf32>,
      %cst_169 = arith.constant 0.000000e+00 : f32
      %532 = vector.broadcast %cst_169 : f32 to vector<2x32xf32>
      %c0_170 = arith.constant 0 : index
      %c0_171 = arith.constant 0 : index
      %533 = vector.load %arg20[%c0_170, %c0_171] : memref<2x32xf32, #tpu.memory_space<vmem>>, vector<2x32xf32>
      tpu.vector_store %arg20[%c0_170, %c0_171], %532 {strides = array<i32>} : memref<2x32xf32, #tpu.memory_space<vmem>>, vector<2x32xf32>,
    } else {
    }
    %c0 = arith.constant 0 : index
    %c0_1 = arith.constant 0 : index
    %3 = vector.load %arg1[%c0, %c0_1] : memref<16x16xbf16, #tpu.memory_space<vmem>>, vector<16x16xbf16>
    %c0_2 = arith.constant 0 : index
    %c0_3 = arith.constant 0 : index
    %4 = vector.load %arg3[%c0_2, %c0_3] : memref<16x128xbf16, #tpu.memory_space<vmem>>, vector<16x128xbf16>
    %cst = arith.constant dense<0.000000e+00> : vector<16x128xf32>
    %5 = tpu.matmul %3, %4, %cst {dimension_numbers = #tpu.dot_dimension_numbers<[1], [0], [0], [1], [0, 0, 1, 1], [], []>} : vector<16x16xbf16>, vector<16x128xbf16>, vector<16x128xf32> -> vector<16x128xf32>
    %c0_4 = arith.constant 0 : index
    %c0_5 = arith.constant 0 : index
    %6 = vector.load %arg7[%c0_4, %c0_5] : memref<1x128xf32, #tpu.memory_space<vmem>>, vector<1x128xf32>
    %7 = vector.broadcast %6 : vector<1x128xf32> to vector<16x128xf32>
    %8 = arith.addf %5, %7 : vector<16x128xf32>
    %c0_6 = arith.constant 0 : index
    %c0_7 = arith.constant 0 : index
    %9 = vector.load %arg15[%c0_6, %c0_7] : memref<16x128xf32, #tpu.memory_space<vmem>>, vector<16x128xf32>
    tpu.vector_store %arg15[%c0_6, %c0_7], %8 {strides = array<i32>} : memref<16x128xf32, #tpu.memory_space<vmem>>, vector<16x128xf32>,
    %c0_8 = arith.constant 0 : index
    %c0_9 = arith.constant 0 : index
    %10 = vector.load %arg2[%c0_8, %c0_9] : memref<16x16xbf16, #tpu.memory_space<vmem>>, vector<16x16xbf16>
    %c0_10 = arith.constant 0 : index
    %c0_11 = arith.constant 0 : index
    %11 = vector.load %arg4[%c0_10, %c0_11] : memref<16x128xbf16, #tpu.memory_space<vmem>>, vector<16x128xbf16>
    %cst_12 = arith.constant dense<0.000000e+00> : vector<16x128xf32>
    %12 = tpu.matmul %10, %11, %cst_12 {dimension_numbers = #tpu.dot_dimension_numbers<[1], [0], [0], [1], [0, 0, 1, 1], [], []>} : vector<16x16xbf16>, vector<16x128xbf16>, vector<16x128xf32> -> vector<16x128xf32>
    %c0_13 = arith.constant 0 : index
    %c0_14 = arith.constant 0 : index
    %13 = vector.load %arg8[%c0_13, %c0_14] : memref<1x128xf32, #tpu.memory_space<vmem>>, vector<1x128xf32>
    %14 = vector.broadcast %13 : vector<1x128xf32> to vector<16x128xf32>
    %15 = arith.addf %12, %14 : vector<16x128xf32>
    %c0_15 = arith.constant 0 : index
    %c0_16 = arith.constant 0 : index
    %16 = vector.load %arg16[%c0_15, %c0_16] : memref<16x128xf32, #tpu.memory_space<vmem>>, vector<16x128xf32>
    tpu.vector_store %arg16[%c0_15, %c0_16], %15 {strides = array<i32>} : memref<16x128xf32, #tpu.memory_space<vmem>>, vector<16x128xf32>,
    %c0_17 = arith.constant 0 : index
    %c0_18 = arith.constant 0 : index
    %17 = vector.load %arg5[%c0_17, %c0_18] : memref<32x128xbf16, #tpu.memory_space<vmem>>, vector<32x128xbf16>
    %c0_19 = arith.constant 0 : index
    %c0_20 = arith.constant 0 : index
    %18 = vector.load %arg6[%c0_19, %c0_20] : memref<32x128xbf16, #tpu.memory_space<vmem>>, vector<32x128xbf16>
    %c0_21 = arith.constant 0 : index
    %c0_22 = arith.constant 0 : index
    %19 = vector.load %arg17[%c0_21, %c0_22] : memref<2x32xf32, #tpu.memory_space<vmem>>, vector<2x32xf32>
    %c0_23 = arith.constant 0 : index
    %c0_24 = arith.constant 0 : index
    %20 = vector.load %arg18[%c0_23, %c0_24] : memref<2x32xf32, #tpu.memory_space<vmem>>, vector<2x32xf32>
    %c0_25 = arith.constant 0 : index
    %c0_26 = arith.constant 0 : index
    %21 = vector.load %arg19[%c0_25, %c0_26] : memref<2x32xf32, #tpu.memory_space<vmem>>, vector<2x32xf32>
    %c0_27 = arith.constant 0 : index
    %c0_28 = arith.constant 0 : index
    %22 = vector.load %arg20[%c0_27, %c0_28] : memref<2x32xf32, #tpu.memory_space<vmem>>, vector<2x32xf32>
    %c0_29 = arith.constant 0 : index
    %c0_30 = arith.constant 0 : index
    %23 = vector.load %arg15[%c0_29, %c0_30] : memref<16x128xf32, #tpu.memory_space<vmem>>, vector<2x128xf32>
    %24 = arith.truncf %19 : vector<2x32xf32> to vector<2x32xbf16>
    %cst_31 = arith.constant dense<0.000000e+00> : vector<2x128xf32>
    %25 = tpu.matmul %24, %17, %cst_31 {dimension_numbers = #tpu.dot_dimension_numbers<[1], [0], [0], [1], [0, 0, 1, 1], [], []>} : vector<2x32xbf16>, vector<32x128xbf16>, vector<2x128xf32> -> vector<2x128xf32>
    %26 = arith.addf %25, %23 : vector<2x128xf32>
    %27 = vector.extract_strided_slice %26 {offsets = [0, 0], sizes = [2, 32], strides = [1, 1]} : vector<2x128xf32> to vector<2x32xf32>
    %28 = arith.negf %27 : vector<2x32xf32>
    %29 = math.exp %28 : vector<2x32xf32>
    %cst_32 = arith.constant 1.000000e+00 : f32
    %30 = vector.broadcast %cst_32 : f32 to vector<2x32xf32>
    %31 = arith.addf %30, %29 : vector<2x32xf32>
    %32 = arith.divf %30, %31 : vector<2x32xf32>
    %33 = vector.extract_strided_slice %26 {offsets = [0, 32], sizes = [2, 32], strides = [1, 1]} : vector<2x128xf32> to vector<2x32xf32>
    %34 = arith.negf %33 : vector<2x32xf32>
    %35 = math.exp %34 : vector<2x32xf32>
    %cst_33 = arith.constant 1.000000e+00 : f32
    %36 = vector.broadcast %cst_33 : f32 to vector<2x32xf32>
    %37 = arith.addf %36, %35 : vector<2x32xf32>
    %38 = arith.divf %36, %37 : vector<2x32xf32>
    %39 = vector.extract_strided_slice %26 {offsets = [0, 64], sizes = [2, 32], strides = [1, 1]} : vector<2x128xf32> to vector<2x32xf32>
    %40 = math.tanh %39 : vector<2x32xf32>
    %41 = vector.extract_strided_slice %26 {offsets = [0, 96], sizes = [2, 32], strides = [1, 1]} : vector<2x128xf32> to vector<2x32xf32>
    %42 = arith.negf %41 : vector<2x32xf32>
    %43 = math.exp %42 : vector<2x32xf32>
    %cst_34 = arith.constant 1.000000e+00 : f32
    %44 = vector.broadcast %cst_34 : f32 to vector<2x32xf32>
    %45 = arith.addf %44, %43 : vector<2x32xf32>
    %46 = arith.divf %44, %45 : vector<2x32xf32>
    %47 = arith.mulf %38, %20 : vector<2x32xf32>
    %48 = arith.mulf %32, %40 : vector<2x32xf32>
    %49 = arith.addf %47, %48 : vector<2x32xf32>
    %50 = math.tanh %49 : vector<2x32xf32>
    %51 = arith.mulf %46, %50 : vector<2x32xf32>
    %c14 = arith.constant 14 : index
    %c0_35 = arith.constant 0 : index
    %52 = vector.load %arg16[%c14, %c0_35] : memref<16x128xf32, #tpu.memory_space<vmem>>, vector<2x128xf32>
    %53 = arith.truncf %21 : vector<2x32xf32> to vector<2x32xbf16>
    %cst_36 = arith.constant dense<0.000000e+00> : vector<2x128xf32>
    %54 = tpu.matmul %53, %18, %cst_36 {dimension_numbers = #tpu.dot_dimension_numbers<[1], [0], [0], [1], [0, 0, 1, 1], [], []>} : vector<2x32xbf16>, vector<32x128xbf16>, vector<2x128xf32> -> vector<2x128xf32>
    %55 = arith.addf %54, %52 : vector<2x128xf32>
    %56 = vector.extract_strided_slice %55 {offsets = [0, 0], sizes = [2, 32], strides = [1, 1]} : vector<2x128xf32> to vector<2x32xf32>
    %57 = arith.negf %56 : vector<2x32xf32>
    %58 = math.exp %57 : vector<2x32xf32>
    %cst_37 = arith.constant 1.000000e+00 : f32
    %59 = vector.broadcast %cst_37 : f32 to vector<2x32xf32>
    %60 = arith.addf %59, %58 : vector<2x32xf32>
    %61 = arith.divf %59, %60 : vector<2x32xf32>
    %62 = vector.extract_strided_slice %55 {offsets = [0, 32], sizes = [2, 32], strides = [1, 1]} : vector<2x128xf32> to vector<2x32xf32>
    %63 = arith.negf %62 : vector<2x32xf32>
    %64 = math.exp %63 : vector<2x32xf32>
    %cst_38 = arith.constant 1.000000e+00 : f32
    %65 = vector.broadcast %cst_38 : f32 to vector<2x32xf32>
    %66 = arith.addf %65, %64 : vector<2x32xf32>
    %67 = arith.divf %65, %66 : vector<2x32xf32>
    %68 = vector.extract_strided_slice %55 {offsets = [0, 64], sizes = [2, 32], strides = [1, 1]} : vector<2x128xf32> to vector<2x32xf32>
    %69 = math.tanh %68 : vector<2x32xf32>
    %70 = vector.extract_strided_slice %55 {offsets = [0, 96], sizes = [2, 32], strides = [1, 1]} : vector<2x128xf32> to vector<2x32xf32>
    %71 = arith.negf %70 : vector<2x32xf32>
    %72 = math.exp %71 : vector<2x32xf32>
    %cst_39 = arith.constant 1.000000e+00 : f32
    %73 = vector.broadcast %cst_39 : f32 to vector<2x32xf32>
    %74 = arith.addf %73, %72 : vector<2x32xf32>
    %75 = arith.divf %73, %74 : vector<2x32xf32>
    %76 = arith.mulf %67, %22 : vector<2x32xf32>
    %77 = arith.mulf %61, %69 : vector<2x32xf32>
    %78 = arith.addf %76, %77 : vector<2x32xf32>
    %79 = math.tanh %78 : vector<2x32xf32>
    %80 = arith.mulf %75, %79 : vector<2x32xf32>
    %81 = arith.truncf %51 : vector<2x32xf32> to vector<2x32xbf16>
    %c0_40 = arith.constant 0 : index
    %c0_41 = arith.constant 0 : index
    %82 = vector.load %arg9[%c0_40, %c0_41] : memref<16x32xbf16, #tpu.memory_space<vmem>>, vector<2x32xbf16>
    tpu.vector_store %arg9[%c0_40, %c0_41], %81 {strides = array<i32>} : memref<16x32xbf16, #tpu.memory_space<vmem>>, vector<2x32xbf16>,
    %83 = arith.truncf %80 : vector<2x32xf32> to vector<2x32xbf16>
    %c14_42 = arith.constant 14 : index
    %c0_43 = arith.constant 0 : index
    %84 = vector.load %arg10[%c14_42, %c0_43] : memref<16x32xbf16, #tpu.memory_space<vmem>>, vector<2x32xbf16>
    tpu.vector_store %arg10[%c14_42, %c0_43], %83 {strides = array<i32>} : memref<16x32xbf16, #tpu.memory_space<vmem>>, vector<2x32xbf16>,
    %c2 = arith.constant 2 : index
    %c0_44 = arith.constant 0 : index
    %85 = vector.load %arg15[%c2, %c0_44] : memref<16x128xf32, #tpu.memory_space<vmem>>, vector<2x128xf32>
    %86 = arith.truncf %51 : vector<2x32xf32> to vector<2x32xbf16>
    %cst_45 = arith.constant dense<0.000000e+00> : vector<2x128xf32>
    %87 = tpu.matmul %86, %17, %cst_45 {dimension_numbers = #tpu.dot_dimension_numbers<[1], [0], [0], [1], [0, 0, 1, 1], [], []>} : vector<2x32xbf16>, vector<32x128xbf16>, vector<2x128xf32> -> vector<2x128xf32>
    %88 = arith.addf %87, %85 : vector<2x128xf32>
    %89 = vector.extract_strided_slice %88 {offsets = [0, 0], sizes = [2, 32], strides = [1, 1]} : vector<2x128xf32> to vector<2x32xf32>
    %90 = arith.negf %89 : vector<2x32xf32>
    %91 = math.exp %90 : vector<2x32xf32>
    %cst_46 = arith.constant 1.000000e+00 : f32
    %92 = vector.broadcast %cst_46 : f32 to vector<2x32xf32>
    %93 = arith.addf %92, %91 : vector<2x32xf32>
    %94 = arith.divf %92, %93 : vector<2x32xf32>
    %95 = vector.extract_strided_slice %88 {offsets = [0, 32], sizes = [2, 32], strides = [1, 1]} : vector<2x128xf32> to vector<2x32xf32>
    %96 = arith.negf %95 : vector<2x32xf32>
    %97 = math.exp %96 : vector<2x32xf32>
    %cst_47 = arith.constant 1.000000e+00 : f32
    %98 = vector.broadcast %cst_47 : f32 to vector<2x32xf32>
    %99 = arith.addf %98, %97 : vector<2x32xf32>
    %100 = arith.divf %98, %99 : vector<2x32xf32>
    %101 = vector.extract_strided_slice %88 {offsets = [0, 64], sizes = [2, 32], strides = [1, 1]} : vector<2x128xf32> to vector<2x32xf32>
    %102 = math.tanh %101 : vector<2x32xf32>
    %103 = vector.extract_strided_slice %88 {offsets = [0, 96], sizes = [2, 32], strides = [1, 1]} : vector<2x128xf32> to vector<2x32xf32>
    %104 = arith.negf %103 : vector<2x32xf32>
    %105 = math.exp %104 : vector<2x32xf32>
    %cst_48 = arith.constant 1.000000e+00 : f32
    %106 = vector.broadcast %cst_48 : f32 to vector<2x32xf32>
    %107 = arith.addf %106, %105 : vector<2x32xf32>
    %108 = arith.divf %106, %107 : vector<2x32xf32>
    %109 = arith.mulf %100, %49 : vector<2x32xf32>
    %110 = arith.mulf %94, %102 : vector<2x32xf32>
    %111 = arith.addf %109, %110 : vector<2x32xf32>
    %112 = math.tanh %111 : vector<2x32xf32>
    %113 = arith.mulf %108, %112 : vector<2x32xf32>
    %c12 = arith.constant 12 : index
    %c0_49 = arith.constant 0 : index
    %114 = vector.load %arg16[%c12, %c0_49] : memref<16x128xf32, #tpu.memory_space<vmem>>, vector<2x128xf32>
    %115 = arith.truncf %80 : vector<2x32xf32> to vector<2x32xbf16>
    %cst_50 = arith.constant dense<0.000000e+00> : vector<2x128xf32>
    %116 = tpu.matmul %115, %18, %cst_50 {dimension_numbers = #tpu.dot_dimension_numbers<[1], [0], [0], [1], [0, 0, 1, 1], [], []>} : vector<2x32xbf16>, vector<32x128xbf16>, vector<2x128xf32> -> vector<2x128xf32>
    %117 = arith.addf %116, %114 : vector<2x128xf32>
    %118 = vector.extract_strided_slice %117 {offsets = [0, 0], sizes = [2, 32], strides = [1, 1]} : vector<2x128xf32> to vector<2x32xf32>
    %119 = arith.negf %118 : vector<2x32xf32>
    %120 = math.exp %119 : vector<2x32xf32>
    %cst_51 = arith.constant 1.000000e+00 : f32
    %121 = vector.broadcast %cst_51 : f32 to vector<2x32xf32>
    %122 = arith.addf %121, %120 : vector<2x32xf32>
    %123 = arith.divf %121, %122 : vector<2x32xf32>
    %124 = vector.extract_strided_slice %117 {offsets = [0, 32], sizes = [2, 32], strides = [1, 1]} : vector<2x128xf32> to vector<2x32xf32>
    %125 = arith.negf %124 : vector<2x32xf32>
    %126 = math.exp %125 : vector<2x32xf32>
    %cst_52 = arith.constant 1.000000e+00 : f32
    %127 = vector.broadcast %cst_52 : f32 to vector<2x32xf32>
    %128 = arith.addf %127, %126 : vector<2x32xf32>
    %129 = arith.divf %127, %128 : vector<2x32xf32>
    %130 = vector.extract_strided_slice %117 {offsets = [0, 64], sizes = [2, 32], strides = [1, 1]} : vector<2x128xf32> to vector<2x32xf32>
    %131 = math.tanh %130 : vector<2x32xf32>
    %132 = vector.extract_strided_slice %117 {offsets = [0, 96], sizes = [2, 32], strides = [1, 1]} : vector<2x128xf32> to vector<2x32xf32>
    %133 = arith.negf %132 : vector<2x32xf32>
    %134 = math.exp %133 : vector<2x32xf32>
    %cst_53 = arith.constant 1.000000e+00 : f32
    %135 = vector.broadcast %cst_53 : f32 to vector<2x32xf32>
    %136 = arith.addf %135, %134 : vector<2x32xf32>
    %137 = arith.divf %135, %136 : vector<2x32xf32>
    %138 = arith.mulf %129, %78 : vector<2x32xf32>
    %139 = arith.mulf %123, %131 : vector<2x32xf32>
    %140 = arith.addf %138, %139 : vector<2x32xf32>
    %141 = math.tanh %140 : vector<2x32xf32>
    %142 = arith.mulf %137, %141 : vector<2x32xf32>
    %143 = arith.truncf %113 : vector<2x32xf32> to vector<2x32xbf16>
    %c2_54 = arith.constant 2 : index
    %c0_55 = arith.constant 0 : index
    %144 = vector.load %arg9[%c2_54, %c0_55] : memref<16x32xbf16, #tpu.memory_space<vmem>>, vector<2x32xbf16>
    tpu.vector_store %arg9[%c2_54, %c0_55], %143 {strides = array<i32>} : memref<16x32xbf16, #tpu.memory_space<vmem>>, vector<2x32xbf16>,
    %145 = arith.truncf %142 : vector<2x32xf32> to vector<2x32xbf16>
    %c12_56 = arith.constant 12 : index
    %c0_57 = arith.constant 0 : index
    %146 = vector.load %arg10[%c12_56, %c0_57] : memref<16x32xbf16, #tpu.memory_space<vmem>>, vector<2x32xbf16>
    tpu.vector_store %arg10[%c12_56, %c0_57], %145 {strides = array<i32>} : memref<16x32xbf16, #tpu.memory_space<vmem>>, vector<2x32xbf16>,
    %c4 = arith.constant 4 : index
    %c0_58 = arith.constant 0 : index
    %147 = vector.load %arg15[%c4, %c0_58] : memref<16x128xf32, #tpu.memory_space<vmem>>, vector<2x128xf32>
    %148 = arith.truncf %113 : vector<2x32xf32> to vector<2x32xbf16>
    %cst_59 = arith.constant dense<0.000000e+00> : vector<2x128xf32>
    %149 = tpu.matmul %148, %17, %cst_59 {dimension_numbers = #tpu.dot_dimension_numbers<[1], [0], [0], [1], [0, 0, 1, 1], [], []>} : vector<2x32xbf16>, vector<32x128xbf16>, vector<2x128xf32> -> vector<2x128xf32>
    %150 = arith.addf %149, %147 : vector<2x128xf32>
    %151 = vector.extract_strided_slice %150 {offsets = [0, 0], sizes = [2, 32], strides = [1, 1]} : vector<2x128xf32> to vector<2x32xf32>
    %152 = arith.negf %151 : vector<2x32xf32>
    %153 = math.exp %152 : vector<2x32xf32>
    %cst_60 = arith.constant 1.000000e+00 : f32
    %154 = vector.broadcast %cst_60 : f32 to vector<2x32xf32>
    %155 = arith.addf %154, %153 : vector<2x32xf32>
    %156 = arith.divf %154, %155 : vector<2x32xf32>
    %157 = vector.extract_strided_slice %150 {offsets = [0, 32], sizes = [2, 32], strides = [1, 1]} : vector<2x128xf32> to vector<2x32xf32>
    %158 = arith.negf %157 : vector<2x32xf32>
    %159 = math.exp %158 : vector<2x32xf32>
    %cst_61 = arith.constant 1.000000e+00 : f32
    %160 = vector.broadcast %cst_61 : f32 to vector<2x32xf32>
    %161 = arith.addf %160, %159 : vector<2x32xf32>
    %162 = arith.divf %160, %161 : vector<2x32xf32>
    %163 = vector.extract_strided_slice %150 {offsets = [0, 64], sizes = [2, 32], strides = [1, 1]} : vector<2x128xf32> to vector<2x32xf32>
    %164 = math.tanh %163 : vector<2x32xf32>
    %165 = vector.extract_strided_slice %150 {offsets = [0, 96], sizes = [2, 32], strides = [1, 1]} : vector<2x128xf32> to vector<2x32xf32>
    %166 = arith.negf %165 : vector<2x32xf32>
    %167 = math.exp %166 : vector<2x32xf32>
    %cst_62 = arith.constant 1.000000e+00 : f32
    %168 = vector.broadcast %cst_62 : f32 to vector<2x32xf32>
    %169 = arith.addf %168, %167 : vector<2x32xf32>
    %170 = arith.divf %168, %169 : vector<2x32xf32>
    %171 = arith.mulf %162, %111 : vector<2x32xf32>
    %172 = arith.mulf %156, %164 : vector<2x32xf32>
    %173 = arith.addf %171, %172 : vector<2x32xf32>
    %174 = math.tanh %173 : vector<2x32xf32>
    %175 = arith.mulf %170, %174 : vector<2x32xf32>
    %c10 = arith.constant 10 : index
    %c0_63 = arith.constant 0 : index
    %176 = vector.load %arg16[%c10, %c0_63] : memref<16x128xf32, #tpu.memory_space<vmem>>, vector<2x128xf32>
    %177 = arith.truncf %142 : vector<2x32xf32> to vector<2x32xbf16>
    %cst_64 = arith.constant dense<0.000000e+00> : vector<2x128xf32>
    %178 = tpu.matmul %177, %18, %cst_64 {dimension_numbers = #tpu.dot_dimension_numbers<[1], [0], [0], [1], [0, 0, 1, 1], [], []>} : vector<2x32xbf16>, vector<32x128xbf16>, vector<2x128xf32> -> vector<2x128xf32>
    %179 = arith.addf %178, %176 : vector<2x128xf32>
    %180 = vector.extract_strided_slice %179 {offsets = [0, 0], sizes = [2, 32], strides = [1, 1]} : vector<2x128xf32> to vector<2x32xf32>
    %181 = arith.negf %180 : vector<2x32xf32>
    %182 = math.exp %181 : vector<2x32xf32>
    %cst_65 = arith.constant 1.000000e+00 : f32
    %183 = vector.broadcast %cst_65 : f32 to vector<2x32xf32>
    %184 = arith.addf %183, %182 : vector<2x32xf32>
    %185 = arith.divf %183, %184 : vector<2x32xf32>
    %186 = vector.extract_strided_slice %179 {offsets = [0, 32], sizes = [2, 32], strides = [1, 1]} : vector<2x128xf32> to vector<2x32xf32>
    %187 = arith.negf %186 : vector<2x32xf32>
    %188 = math.exp %187 : vector<2x32xf32>
    %cst_66 = arith.constant 1.000000e+00 : f32
    %189 = vector.broadcast %cst_66 : f32 to vector<2x32xf32>
    %190 = arith.addf %189, %188 : vector<2x32xf32>
    %191 = arith.divf %189, %190 : vector<2x32xf32>
    %192 = vector.extract_strided_slice %179 {offsets = [0, 64], sizes = [2, 32], strides = [1, 1]} : vector<2x128xf32> to vector<2x32xf32>
    %193 = math.tanh %192 : vector<2x32xf32>
    %194 = vector.extract_strided_slice %179 {offsets = [0, 96], sizes = [2, 32], strides = [1, 1]} : vector<2x128xf32> to vector<2x32xf32>
    %195 = arith.negf %194 : vector<2x32xf32>
    %196 = math.exp %195 : vector<2x32xf32>
    %cst_67 = arith.constant 1.000000e+00 : f32
    %197 = vector.broadcast %cst_67 : f32 to vector<2x32xf32>
    %198 = arith.addf %197, %196 : vector<2x32xf32>
    %199 = arith.divf %197, %198 : vector<2x32xf32>
    %200 = arith.mulf %191, %140 : vector<2x32xf32>
    %201 = arith.mulf %185, %193 : vector<2x32xf32>
    %202 = arith.addf %200, %201 : vector<2x32xf32>
    %203 = math.tanh %202 : vector<2x32xf32>
    %204 = arith.mulf %199, %203 : vector<2x32xf32>
    %205 = arith.truncf %175 : vector<2x32xf32> to vector<2x32xbf16>
    %c4_68 = arith.constant 4 : index
    %c0_69 = arith.constant 0 : index
    %206 = vector.load %arg9[%c4_68, %c0_69] : memref<16x32xbf16, #tpu.memory_space<vmem>>, vector<2x32xbf16>
    tpu.vector_store %arg9[%c4_68, %c0_69], %205 {strides = array<i32>} : memref<16x32xbf16, #tpu.memory_space<vmem>>, vector<2x32xbf16>,
    %207 = arith.truncf %204 : vector<2x32xf32> to vector<2x32xbf16>
    %c10_70 = arith.constant 10 : index
    %c0_71 = arith.constant 0 : index
    %208 = vector.load %arg10[%c10_70, %c0_71] : memref<16x32xbf16, #tpu.memory_space<vmem>>, vector<2x32xbf16>
    tpu.vector_store %arg10[%c10_70, %c0_71], %207 {strides = array<i32>} : memref<16x32xbf16, #tpu.memory_space<vmem>>, vector<2x32xbf16>,
    %c6 = arith.constant 6 : index
    %c0_72 = arith.constant 0 : index
    %209 = vector.load %arg15[%c6, %c0_72] : memref<16x128xf32, #tpu.memory_space<vmem>>, vector<2x128xf32>
    %210 = arith.truncf %175 : vector<2x32xf32> to vector<2x32xbf16>
    %cst_73 = arith.constant dense<0.000000e+00> : vector<2x128xf32>
    %211 = tpu.matmul %210, %17, %cst_73 {dimension_numbers = #tpu.dot_dimension_numbers<[1], [0], [0], [1], [0, 0, 1, 1], [], []>} : vector<2x32xbf16>, vector<32x128xbf16>, vector<2x128xf32> -> vector<2x128xf32>
    %212 = arith.addf %211, %209 : vector<2x128xf32>
    %213 = vector.extract_strided_slice %212 {offsets = [0, 0], sizes = [2, 32], strides = [1, 1]} : vector<2x128xf32> to vector<2x32xf32>
    %214 = arith.negf %213 : vector<2x32xf32>
    %215 = math.exp %214 : vector<2x32xf32>
    %cst_74 = arith.constant 1.000000e+00 : f32
    %216 = vector.broadcast %cst_74 : f32 to vector<2x32xf32>
    %217 = arith.addf %216, %215 : vector<2x32xf32>
    %218 = arith.divf %216, %217 : vector<2x32xf32>
    %219 = vector.extract_strided_slice %212 {offsets = [0, 32], sizes = [2, 32], strides = [1, 1]} : vector<2x128xf32> to vector<2x32xf32>
    %220 = arith.negf %219 : vector<2x32xf32>
    %221 = math.exp %220 : vector<2x32xf32>
    %cst_75 = arith.constant 1.000000e+00 : f32
    %222 = vector.broadcast %cst_75 : f32 to vector<2x32xf32>
    %223 = arith.addf %222, %221 : vector<2x32xf32>
    %224 = arith.divf %222, %223 : vector<2x32xf32>
    %225 = vector.extract_strided_slice %212 {offsets = [0, 64], sizes = [2, 32], strides = [1, 1]} : vector<2x128xf32> to vector<2x32xf32>
    %226 = math.tanh %225 : vector<2x32xf32>
    %227 = vector.extract_strided_slice %212 {offsets = [0, 96], sizes = [2, 32], strides = [1, 1]} : vector<2x128xf32> to vector<2x32xf32>
    %228 = arith.negf %227 : vector<2x32xf32>
    %229 = math.exp %228 : vector<2x32xf32>
    %cst_76 = arith.constant 1.000000e+00 : f32
    %230 = vector.broadcast %cst_76 : f32 to vector<2x32xf32>
    %231 = arith.addf %230, %229 : vector<2x32xf32>
    %232 = arith.divf %230, %231 : vector<2x32xf32>
    %233 = arith.mulf %224, %173 : vector<2x32xf32>
    %234 = arith.mulf %218, %226 : vector<2x32xf32>
    %235 = arith.addf %233, %234 : vector<2x32xf32>
    %236 = math.tanh %235 : vector<2x32xf32>
    %237 = arith.mulf %232, %236 : vector<2x32xf32>
    %c8 = arith.constant 8 : index
    %c0_77 = arith.constant 0 : index
    %238 = vector.load %arg16[%c8, %c0_77] : memref<16x128xf32, #tpu.memory_space<vmem>>, vector<2x128xf32>
    %239 = arith.truncf %204 : vector<2x32xf32> to vector<2x32xbf16>
    %cst_78 = arith.constant dense<0.000000e+00> : vector<2x128xf32>
    %240 = tpu.matmul %239, %18, %cst_78 {dimension_numbers = #tpu.dot_dimension_numbers<[1], [0], [0], [1], [0, 0, 1, 1], [], []>} : vector<2x32xbf16>, vector<32x128xbf16>, vector<2x128xf32> -> vector<2x128xf32>
    %241 = arith.addf %240, %238 : vector<2x128xf32>
    %242 = vector.extract_strided_slice %241 {offsets = [0, 0], sizes = [2, 32], strides = [1, 1]} : vector<2x128xf32> to vector<2x32xf32>
    %243 = arith.negf %242 : vector<2x32xf32>
    %244 = math.exp %243 : vector<2x32xf32>
    %cst_79 = arith.constant 1.000000e+00 : f32
    %245 = vector.broadcast %cst_79 : f32 to vector<2x32xf32>
    %246 = arith.addf %245, %244 : vector<2x32xf32>
    %247 = arith.divf %245, %246 : vector<2x32xf32>
    %248 = vector.extract_strided_slice %241 {offsets = [0, 32], sizes = [2, 32], strides = [1, 1]} : vector<2x128xf32> to vector<2x32xf32>
    %249 = arith.negf %248 : vector<2x32xf32>
    %250 = math.exp %249 : vector<2x32xf32>
    %cst_80 = arith.constant 1.000000e+00 : f32
    %251 = vector.broadcast %cst_80 : f32 to vector<2x32xf32>
    %252 = arith.addf %251, %250 : vector<2x32xf32>
    %253 = arith.divf %251, %252 : vector<2x32xf32>
    %254 = vector.extract_strided_slice %241 {offsets = [0, 64], sizes = [2, 32], strides = [1, 1]} : vector<2x128xf32> to vector<2x32xf32>
    %255 = math.tanh %254 : vector<2x32xf32>
    %256 = vector.extract_strided_slice %241 {offsets = [0, 96], sizes = [2, 32], strides = [1, 1]} : vector<2x128xf32> to vector<2x32xf32>
    %257 = arith.negf %256 : vector<2x32xf32>
    %258 = math.exp %257 : vector<2x32xf32>
    %cst_81 = arith.constant 1.000000e+00 : f32
    %259 = vector.broadcast %cst_81 : f32 to vector<2x32xf32>
    %260 = arith.addf %259, %258 : vector<2x32xf32>
    %261 = arith.divf %259, %260 : vector<2x32xf32>
    %262 = arith.mulf %253, %202 : vector<2x32xf32>
    %263 = arith.mulf %247, %255 : vector<2x32xf32>
    %264 = arith.addf %262, %263 : vector<2x32xf32>
    %265 = math.tanh %264 : vector<2x32xf32>
    %266 = arith.mulf %261, %265 : vector<2x32xf32>
    %267 = arith.truncf %237 : vector<2x32xf32> to vector<2x32xbf16>
    %c6_82 = arith.constant 6 : index
    %c0_83 = arith.constant 0 : index
    %268 = vector.load %arg9[%c6_82, %c0_83] : memref<16x32xbf16, #tpu.memory_space<vmem>>, vector<2x32xbf16>
    tpu.vector_store %arg9[%c6_82, %c0_83], %267 {strides = array<i32>} : memref<16x32xbf16, #tpu.memory_space<vmem>>, vector<2x32xbf16>,
    %269 = arith.truncf %266 : vector<2x32xf32> to vector<2x32xbf16>
    %c8_84 = arith.constant 8 : index
    %c0_85 = arith.constant 0 : index
    %270 = vector.load %arg10[%c8_84, %c0_85] : memref<16x32xbf16, #tpu.memory_space<vmem>>, vector<2x32xbf16>
    tpu.vector_store %arg10[%c8_84, %c0_85], %269 {strides = array<i32>} : memref<16x32xbf16, #tpu.memory_space<vmem>>, vector<2x32xbf16>,
    %c8_86 = arith.constant 8 : index
    %c0_87 = arith.constant 0 : index
    %271 = vector.load %arg15[%c8_86, %c0_87] : memref<16x128xf32, #tpu.memory_space<vmem>>, vector<2x128xf32>
    %272 = arith.truncf %237 : vector<2x32xf32> to vector<2x32xbf16>
    %cst_88 = arith.constant dense<0.000000e+00> : vector<2x128xf32>
    %273 = tpu.matmul %272, %17, %cst_88 {dimension_numbers = #tpu.dot_dimension_numbers<[1], [0], [0], [1], [0, 0, 1, 1], [], []>} : vector<2x32xbf16>, vector<32x128xbf16>, vector<2x128xf32> -> vector<2x128xf32>
    %274 = arith.addf %273, %271 : vector<2x128xf32>
    %275 = vector.extract_strided_slice %274 {offsets = [0, 0], sizes = [2, 32], strides = [1, 1]} : vector<2x128xf32> to vector<2x32xf32>
    %276 = arith.negf %275 : vector<2x32xf32>
    %277 = math.exp %276 : vector<2x32xf32>
    %cst_89 = arith.constant 1.000000e+00 : f32
    %278 = vector.broadcast %cst_89 : f32 to vector<2x32xf32>
    %279 = arith.addf %278, %277 : vector<2x32xf32>
    %280 = arith.divf %278, %279 : vector<2x32xf32>
    %281 = vector.extract_strided_slice %274 {offsets = [0, 32], sizes = [2, 32], strides = [1, 1]} : vector<2x128xf32> to vector<2x32xf32>
    %282 = arith.negf %281 : vector<2x32xf32>
    %283 = math.exp %282 : vector<2x32xf32>
    %cst_90 = arith.constant 1.000000e+00 : f32
    %284 = vector.broadcast %cst_90 : f32 to vector<2x32xf32>
    %285 = arith.addf %284, %283 : vector<2x32xf32>
    %286 = arith.divf %284, %285 : vector<2x32xf32>
    %287 = vector.extract_strided_slice %274 {offsets = [0, 64], sizes = [2, 32], strides = [1, 1]} : vector<2x128xf32> to vector<2x32xf32>
    %288 = math.tanh %287 : vector<2x32xf32>
    %289 = vector.extract_strided_slice %274 {offsets = [0, 96], sizes = [2, 32], strides = [1, 1]} : vector<2x128xf32> to vector<2x32xf32>
    %290 = arith.negf %289 : vector<2x32xf32>
    %291 = math.exp %290 : vector<2x32xf32>
    %cst_91 = arith.constant 1.000000e+00 : f32
    %292 = vector.broadcast %cst_91 : f32 to vector<2x32xf32>
    %293 = arith.addf %292, %291 : vector<2x32xf32>
    %294 = arith.divf %292, %293 : vector<2x32xf32>
    %295 = arith.mulf %286, %235 : vector<2x32xf32>
    %296 = arith.mulf %280, %288 : vector<2x32xf32>
    %297 = arith.addf %295, %296 : vector<2x32xf32>
    %298 = math.tanh %297 : vector<2x32xf32>
    %299 = arith.mulf %294, %298 : vector<2x32xf32>
    %c6_92 = arith.constant 6 : index
    %c0_93 = arith.constant 0 : index
    %300 = vector.load %arg16[%c6_92, %c0_93] : memref<16x128xf32, #tpu.memory_space<vmem>>, vector<2x128xf32>
    %301 = arith.truncf %266 : vector<2x32xf32> to vector<2x32xbf16>
    %cst_94 = arith.constant dense<0.000000e+00> : vector<2x128xf32>
    %302 = tpu.matmul %301, %18, %cst_94 {dimension_numbers = #tpu.dot_dimension_numbers<[1], [0], [0], [1], [0, 0, 1, 1], [], []>} : vector<2x32xbf16>, vector<32x128xbf16>, vector<2x128xf32> -> vector<2x128xf32>
    %303 = arith.addf %302, %300 : vector<2x128xf32>
    %304 = vector.extract_strided_slice %303 {offsets = [0, 0], sizes = [2, 32], strides = [1, 1]} : vector<2x128xf32> to vector<2x32xf32>
    %305 = arith.negf %304 : vector<2x32xf32>
    %306 = math.exp %305 : vector<2x32xf32>
    %cst_95 = arith.constant 1.000000e+00 : f32
    %307 = vector.broadcast %cst_95 : f32 to vector<2x32xf32>
    %308 = arith.addf %307, %306 : vector<2x32xf32>
    %309 = arith.divf %307, %308 : vector<2x32xf32>
    %310 = vector.extract_strided_slice %303 {offsets = [0, 32], sizes = [2, 32], strides = [1, 1]} : vector<2x128xf32> to vector<2x32xf32>
    %311 = arith.negf %310 : vector<2x32xf32>
    %312 = math.exp %311 : vector<2x32xf32>
    %cst_96 = arith.constant 1.000000e+00 : f32
    %313 = vector.broadcast %cst_96 : f32 to vector<2x32xf32>
    %314 = arith.addf %313, %312 : vector<2x32xf32>
    %315 = arith.divf %313, %314 : vector<2x32xf32>
    %316 = vector.extract_strided_slice %303 {offsets = [0, 64], sizes = [2, 32], strides = [1, 1]} : vector<2x128xf32> to vector<2x32xf32>
    %317 = math.tanh %316 : vector<2x32xf32>
    %318 = vector.extract_strided_slice %303 {offsets = [0, 96], sizes = [2, 32], strides = [1, 1]} : vector<2x128xf32> to vector<2x32xf32>
    %319 = arith.negf %318 : vector<2x32xf32>
    %320 = math.exp %319 : vector<2x32xf32>
    %cst_97 = arith.constant 1.000000e+00 : f32
    %321 = vector.broadcast %cst_97 : f32 to vector<2x32xf32>
    %322 = arith.addf %321, %320 : vector<2x32xf32>
    %323 = arith.divf %321, %322 : vector<2x32xf32>
    %324 = arith.mulf %315, %264 : vector<2x32xf32>
    %325 = arith.mulf %309, %317 : vector<2x32xf32>
    %326 = arith.addf %324, %325 : vector<2x32xf32>
    %327 = math.tanh %326 : vector<2x32xf32>
    %328 = arith.mulf %323, %327 : vector<2x32xf32>
    %329 = arith.truncf %299 : vector<2x32xf32> to vector<2x32xbf16>
    %c8_98 = arith.constant 8 : index
    %c0_99 = arith.constant 0 : index
    %330 = vector.load %arg9[%c8_98, %c0_99] : memref<16x32xbf16, #tpu.memory_space<vmem>>, vector<2x32xbf16>
    tpu.vector_store %arg9[%c8_98, %c0_99], %329 {strides = array<i32>} : memref<16x32xbf16, #tpu.memory_space<vmem>>, vector<2x32xbf16>,
    %331 = arith.truncf %328 : vector<2x32xf32> to vector<2x32xbf16>
    %c6_100 = arith.constant 6 : index
    %c0_101 = arith.constant 0 : index
    %332 = vector.load %arg10[%c6_100, %c0_101] : memref<16x32xbf16, #tpu.memory_space<vmem>>, vector<2x32xbf16>
    tpu.vector_store %arg10[%c6_100, %c0_101], %331 {strides = array<i32>} : memref<16x32xbf16, #tpu.memory_space<vmem>>, vector<2x32xbf16>,
    %c10_102 = arith.constant 10 : index
    %c0_103 = arith.constant 0 : index
    %333 = vector.load %arg15[%c10_102, %c0_103] : memref<16x128xf32, #tpu.memory_space<vmem>>, vector<2x128xf32>
    %334 = arith.truncf %299 : vector<2x32xf32> to vector<2x32xbf16>
    %cst_104 = arith.constant dense<0.000000e+00> : vector<2x128xf32>
    %335 = tpu.matmul %334, %17, %cst_104 {dimension_numbers = #tpu.dot_dimension_numbers<[1], [0], [0], [1], [0, 0, 1, 1], [], []>} : vector<2x32xbf16>, vector<32x128xbf16>, vector<2x128xf32> -> vector<2x128xf32>
    %336 = arith.addf %335, %333 : vector<2x128xf32>
    %337 = vector.extract_strided_slice %336 {offsets = [0, 0], sizes = [2, 32], strides = [1, 1]} : vector<2x128xf32> to vector<2x32xf32>
    %338 = arith.negf %337 : vector<2x32xf32>
    %339 = math.exp %338 : vector<2x32xf32>
    %cst_105 = arith.constant 1.000000e+00 : f32
    %340 = vector.broadcast %cst_105 : f32 to vector<2x32xf32>
    %341 = arith.addf %340, %339 : vector<2x32xf32>
    %342 = arith.divf %340, %341 : vector<2x32xf32>
    %343 = vector.extract_strided_slice %336 {offsets = [0, 32], sizes = [2, 32], strides = [1, 1]} : vector<2x128xf32> to vector<2x32xf32>
    %344 = arith.negf %343 : vector<2x32xf32>
    %345 = math.exp %344 : vector<2x32xf32>
    %cst_106 = arith.constant 1.000000e+00 : f32
    %346 = vector.broadcast %cst_106 : f32 to vector<2x32xf32>
    %347 = arith.addf %346, %345 : vector<2x32xf32>
    %348 = arith.divf %346, %347 : vector<2x32xf32>
    %349 = vector.extract_strided_slice %336 {offsets = [0, 64], sizes = [2, 32], strides = [1, 1]} : vector<2x128xf32> to vector<2x32xf32>
    %350 = math.tanh %349 : vector<2x32xf32>
    %351 = vector.extract_strided_slice %336 {offsets = [0, 96], sizes = [2, 32], strides = [1, 1]} : vector<2x128xf32> to vector<2x32xf32>
    %352 = arith.negf %351 : vector<2x32xf32>
    %353 = math.exp %352 : vector<2x32xf32>
    %cst_107 = arith.constant 1.000000e+00 : f32
    %354 = vector.broadcast %cst_107 : f32 to vector<2x32xf32>
    %355 = arith.addf %354, %353 : vector<2x32xf32>
    %356 = arith.divf %354, %355 : vector<2x32xf32>
    %357 = arith.mulf %348, %297 : vector<2x32xf32>
    %358 = arith.mulf %342, %350 : vector<2x32xf32>
    %359 = arith.addf %357, %358 : vector<2x32xf32>
    %360 = math.tanh %359 : vector<2x32xf32>
    %361 = arith.mulf %356, %360 : vector<2x32xf32>
    %c4_108 = arith.constant 4 : index
    %c0_109 = arith.constant 0 : index
    %362 = vector.load %arg16[%c4_108, %c0_109] : memref<16x128xf32, #tpu.memory_space<vmem>>, vector<2x128xf32>
    %363 = arith.truncf %328 : vector<2x32xf32> to vector<2x32xbf16>
    %cst_110 = arith.constant dense<0.000000e+00> : vector<2x128xf32>
    %364 = tpu.matmul %363, %18, %cst_110 {dimension_numbers = #tpu.dot_dimension_numbers<[1], [0], [0], [1], [0, 0, 1, 1], [], []>} : vector<2x32xbf16>, vector<32x128xbf16>, vector<2x128xf32> -> vector<2x128xf32>
    %365 = arith.addf %364, %362 : vector<2x128xf32>
    %366 = vector.extract_strided_slice %365 {offsets = [0, 0], sizes = [2, 32], strides = [1, 1]} : vector<2x128xf32> to vector<2x32xf32>
    %367 = arith.negf %366 : vector<2x32xf32>
    %368 = math.exp %367 : vector<2x32xf32>
    %cst_111 = arith.constant 1.000000e+00 : f32
    %369 = vector.broadcast %cst_111 : f32 to vector<2x32xf32>
    %370 = arith.addf %369, %368 : vector<2x32xf32>
    %371 = arith.divf %369, %370 : vector<2x32xf32>
    %372 = vector.extract_strided_slice %365 {offsets = [0, 32], sizes = [2, 32], strides = [1, 1]} : vector<2x128xf32> to vector<2x32xf32>
    %373 = arith.negf %372 : vector<2x32xf32>
    %374 = math.exp %373 : vector<2x32xf32>
    %cst_112 = arith.constant 1.000000e+00 : f32
    %375 = vector.broadcast %cst_112 : f32 to vector<2x32xf32>
    %376 = arith.addf %375, %374 : vector<2x32xf32>
    %377 = arith.divf %375, %376 : vector<2x32xf32>
    %378 = vector.extract_strided_slice %365 {offsets = [0, 64], sizes = [2, 32], strides = [1, 1]} : vector<2x128xf32> to vector<2x32xf32>
    %379 = math.tanh %378 : vector<2x32xf32>
    %380 = vector.extract_strided_slice %365 {offsets = [0, 96], sizes = [2, 32], strides = [1, 1]} : vector<2x128xf32> to vector<2x32xf32>
    %381 = arith.negf %380 : vector<2x32xf32>
    %382 = math.exp %381 : vector<2x32xf32>
    %cst_113 = arith.constant 1.000000e+00 : f32
    %383 = vector.broadcast %cst_113 : f32 to vector<2x32xf32>
    %384 = arith.addf %383, %382 : vector<2x32xf32>
    %385 = arith.divf %383, %384 : vector<2x32xf32>
    %386 = arith.mulf %377, %326 : vector<2x32xf32>
    %387 = arith.mulf %371, %379 : vector<2x32xf32>
    %388 = arith.addf %386, %387 : vector<2x32xf32>
    %389 = math.tanh %388 : vector<2x32xf32>
    %390 = arith.mulf %385, %389 : vector<2x32xf32>
    %391 = arith.truncf %361 : vector<2x32xf32> to vector<2x32xbf16>
    %c10_114 = arith.constant 10 : index
    %c0_115 = arith.constant 0 : index
    %392 = vector.load %arg9[%c10_114, %c0_115] : memref<16x32xbf16, #tpu.memory_space<vmem>>, vector<2x32xbf16>
    tpu.vector_store %arg9[%c10_114, %c0_115], %391 {strides = array<i32>} : memref<16x32xbf16, #tpu.memory_space<vmem>>, vector<2x32xbf16>,
    %393 = arith.truncf %390 : vector<2x32xf32> to vector<2x32xbf16>
    %c4_116 = arith.constant 4 : index
    %c0_117 = arith.constant 0 : index
    %394 = vector.load %arg10[%c4_116, %c0_117] : memref<16x32xbf16, #tpu.memory_space<vmem>>, vector<2x32xbf16>
    tpu.vector_store %arg10[%c4_116, %c0_117], %393 {strides = array<i32>} : memref<16x32xbf16, #tpu.memory_space<vmem>>, vector<2x32xbf16>,
    %c12_118 = arith.constant 12 : index
    %c0_119 = arith.constant 0 : index
    %395 = vector.load %arg15[%c12_118, %c0_119] : memref<16x128xf32, #tpu.memory_space<vmem>>, vector<2x128xf32>
    %396 = arith.truncf %361 : vector<2x32xf32> to vector<2x32xbf16>
    %cst_120 = arith.constant dense<0.000000e+00> : vector<2x128xf32>
    %397 = tpu.matmul %396, %17, %cst_120 {dimension_numbers = #tpu.dot_dimension_numbers<[1], [0], [0], [1], [0, 0, 1, 1], [], []>} : vector<2x32xbf16>, vector<32x128xbf16>, vector<2x128xf32> -> vector<2x128xf32>
    %398 = arith.addf %397, %395 : vector<2x128xf32>
    %399 = vector.extract_strided_slice %398 {offsets = [0, 0], sizes = [2, 32], strides = [1, 1]} : vector<2x128xf32> to vector<2x32xf32>
    %400 = arith.negf %399 : vector<2x32xf32>
    %401 = math.exp %400 : vector<2x32xf32>
    %cst_121 = arith.constant 1.000000e+00 : f32
    %402 = vector.broadcast %cst_121 : f32 to vector<2x32xf32>
    %403 = arith.addf %402, %401 : vector<2x32xf32>
    %404 = arith.divf %402, %403 : vector<2x32xf32>
    %405 = vector.extract_strided_slice %398 {offsets = [0, 32], sizes = [2, 32], strides = [1, 1]} : vector<2x128xf32> to vector<2x32xf32>
    %406 = arith.negf %405 : vector<2x32xf32>
    %407 = math.exp %406 : vector<2x32xf32>
    %cst_122 = arith.constant 1.000000e+00 : f32
    %408 = vector.broadcast %cst_122 : f32 to vector<2x32xf32>
    %409 = arith.addf %408, %407 : vector<2x32xf32>
    %410 = arith.divf %408, %409 : vector<2x32xf32>
    %411 = vector.extract_strided_slice %398 {offsets = [0, 64], sizes = [2, 32], strides = [1, 1]} : vector<2x128xf32> to vector<2x32xf32>
    %412 = math.tanh %411 : vector<2x32xf32>
    %413 = vector.extract_strided_slice %398 {offsets = [0, 96], sizes = [2, 32], strides = [1, 1]} : vector<2x128xf32> to vector<2x32xf32>
    %414 = arith.negf %413 : vector<2x32xf32>
    %415 = math.exp %414 : vector<2x32xf32>
    %cst_123 = arith.constant 1.000000e+00 : f32
    %416 = vector.broadcast %cst_123 : f32 to vector<2x32xf32>
    %417 = arith.addf %416, %415 : vector<2x32xf32>
    %418 = arith.divf %416, %417 : vector<2x32xf32>
    %419 = arith.mulf %410, %359 : vector<2x32xf32>
    %420 = arith.mulf %404, %412 : vector<2x32xf32>
    %421 = arith.addf %419, %420 : vector<2x32xf32>
    %422 = math.tanh %421 : vector<2x32xf32>
    %423 = arith.mulf %418, %422 : vector<2x32xf32>
    %c2_124 = arith.constant 2 : index
    %c0_125 = arith.constant 0 : index
    %424 = vector.load %arg16[%c2_124, %c0_125] : memref<16x128xf32, #tpu.memory_space<vmem>>, vector<2x128xf32>
    %425 = arith.truncf %390 : vector<2x32xf32> to vector<2x32xbf16>
    %cst_126 = arith.constant dense<0.000000e+00> : vector<2x128xf32>
    %426 = tpu.matmul %425, %18, %cst_126 {dimension_numbers = #tpu.dot_dimension_numbers<[1], [0], [0], [1], [0, 0, 1, 1], [], []>} : vector<2x32xbf16>, vector<32x128xbf16>, vector<2x128xf32> -> vector<2x128xf32>
    %427 = arith.addf %426, %424 : vector<2x128xf32>
    %428 = vector.extract_strided_slice %427 {offsets = [0, 0], sizes = [2, 32], strides = [1, 1]} : vector<2x128xf32> to vector<2x32xf32>
    %429 = arith.negf %428 : vector<2x32xf32>
    %430 = math.exp %429 : vector<2x32xf32>
    %cst_127 = arith.constant 1.000000e+00 : f32
    %431 = vector.broadcast %cst_127 : f32 to vector<2x32xf32>
    %432 = arith.addf %431, %430 : vector<2x32xf32>
    %433 = arith.divf %431, %432 : vector<2x32xf32>
    %434 = vector.extract_strided_slice %427 {offsets = [0, 32], sizes = [2, 32], strides = [1, 1]} : vector<2x128xf32> to vector<2x32xf32>
    %435 = arith.negf %434 : vector<2x32xf32>
    %436 = math.exp %435 : vector<2x32xf32>
    %cst_128 = arith.constant 1.000000e+00 : f32
    %437 = vector.broadcast %cst_128 : f32 to vector<2x32xf32>
    %438 = arith.addf %437, %436 : vector<2x32xf32>
    %439 = arith.divf %437, %438 : vector<2x32xf32>
    %440 = vector.extract_strided_slice %427 {offsets = [0, 64], sizes = [2, 32], strides = [1, 1]} : vector<2x128xf32> to vector<2x32xf32>
    %441 = math.tanh %440 : vector<2x32xf32>
    %442 = vector.extract_strided_slice %427 {offsets = [0, 96], sizes = [2, 32], strides = [1, 1]} : vector<2x128xf32> to vector<2x32xf32>
    %443 = arith.negf %442 : vector<2x32xf32>
    %444 = math.exp %443 : vector<2x32xf32>
    %cst_129 = arith.constant 1.000000e+00 : f32
    %445 = vector.broadcast %cst_129 : f32 to vector<2x32xf32>
    %446 = arith.addf %445, %444 : vector<2x32xf32>
    %447 = arith.divf %445, %446 : vector<2x32xf32>
    %448 = arith.mulf %439, %388 : vector<2x32xf32>
    %449 = arith.mulf %433, %441 : vector<2x32xf32>
    %450 = arith.addf %448, %449 : vector<2x32xf32>
    %451 = math.tanh %450 : vector<2x32xf32>
    %452 = arith.mulf %447, %451 : vector<2x32xf32>
    %453 = arith.truncf %423 : vector<2x32xf32> to vector<2x32xbf16>
    %c12_130 = arith.constant 12 : index
    %c0_131 = arith.constant 0 : index
    %454 = vector.load %arg9[%c12_130, %c0_131] : memref<16x32xbf16, #tpu.memory_space<vmem>>, vector<2x32xbf16>
    tpu.vector_store %arg9[%c12_130, %c0_131], %453 {strides = array<i32>} : memref<16x32xbf16, #tpu.memory_space<vmem>>, vector<2x32xbf16>,
    %455 = arith.truncf %452 : vector<2x32xf32> to vector<2x32xbf16>
    %c2_132 = arith.constant 2 : index
    %c0_133 = arith.constant 0 : index
    %456 = vector.load %arg10[%c2_132, %c0_133] : memref<16x32xbf16, #tpu.memory_space<vmem>>, vector<2x32xbf16>
    tpu.vector_store %arg10[%c2_132, %c0_133], %455 {strides = array<i32>} : memref<16x32xbf16, #tpu.memory_space<vmem>>, vector<2x32xbf16>,
    %c14_134 = arith.constant 14 : index
    %c0_135 = arith.constant 0 : index
    %457 = vector.load %arg15[%c14_134, %c0_135] : memref<16x128xf32, #tpu.memory_space<vmem>>, vector<2x128xf32>
    %458 = arith.truncf %423 : vector<2x32xf32> to vector<2x32xbf16>
    %cst_136 = arith.constant dense<0.000000e+00> : vector<2x128xf32>
    %459 = tpu.matmul %458, %17, %cst_136 {dimension_numbers = #tpu.dot_dimension_numbers<[1], [0], [0], [1], [0, 0, 1, 1], [], []>} : vector<2x32xbf16>, vector<32x128xbf16>, vector<2x128xf32> -> vector<2x128xf32>
    %460 = arith.addf %459, %457 : vector<2x128xf32>
    %461 = vector.extract_strided_slice %460 {offsets = [0, 0], sizes = [2, 32], strides = [1, 1]} : vector<2x128xf32> to vector<2x32xf32>
    %462 = arith.negf %461 : vector<2x32xf32>
    %463 = math.exp %462 : vector<2x32xf32>
    %cst_137 = arith.constant 1.000000e+00 : f32
    %464 = vector.broadcast %cst_137 : f32 to vector<2x32xf32>
    %465 = arith.addf %464, %463 : vector<2x32xf32>
    %466 = arith.divf %464, %465 : vector<2x32xf32>
    %467 = vector.extract_strided_slice %460 {offsets = [0, 32], sizes = [2, 32], strides = [1, 1]} : vector<2x128xf32> to vector<2x32xf32>
    %468 = arith.negf %467 : vector<2x32xf32>
    %469 = math.exp %468 : vector<2x32xf32>
    %cst_138 = arith.constant 1.000000e+00 : f32
    %470 = vector.broadcast %cst_138 : f32 to vector<2x32xf32>
    %471 = arith.addf %470, %469 : vector<2x32xf32>
    %472 = arith.divf %470, %471 : vector<2x32xf32>
    %473 = vector.extract_strided_slice %460 {offsets = [0, 64], sizes = [2, 32], strides = [1, 1]} : vector<2x128xf32> to vector<2x32xf32>
    %474 = math.tanh %473 : vector<2x32xf32>
    %475 = vector.extract_strided_slice %460 {offsets = [0, 96], sizes = [2, 32], strides = [1, 1]} : vector<2x128xf32> to vector<2x32xf32>
    %476 = arith.negf %475 : vector<2x32xf32>
    %477 = math.exp %476 : vector<2x32xf32>
    %cst_139 = arith.constant 1.000000e+00 : f32
    %478 = vector.broadcast %cst_139 : f32 to vector<2x32xf32>
    %479 = arith.addf %478, %477 : vector<2x32xf32>
    %480 = arith.divf %478, %479 : vector<2x32xf32>
    %481 = arith.mulf %472, %421 : vector<2x32xf32>
    %482 = arith.mulf %466, %474 : vector<2x32xf32>
    %483 = arith.addf %481, %482 : vector<2x32xf32>
    %484 = math.tanh %483 : vector<2x32xf32>
    %485 = arith.mulf %480, %484 : vector<2x32xf32>
    %c0_140 = arith.constant 0 : index
    %c0_141 = arith.constant 0 : index
    %486 = vector.load %arg16[%c0_140, %c0_141] : memref<16x128xf32, #tpu.memory_space<vmem>>, vector<2x128xf32>
    %487 = arith.truncf %452 : vector<2x32xf32> to vector<2x32xbf16>
    %cst_142 = arith.constant dense<0.000000e+00> : vector<2x128xf32>
    %488 = tpu.matmul %487, %18, %cst_142 {dimension_numbers = #tpu.dot_dimension_numbers<[1], [0], [0], [1], [0, 0, 1, 1], [], []>} : vector<2x32xbf16>, vector<32x128xbf16>, vector<2x128xf32> -> vector<2x128xf32>
    %489 = arith.addf %488, %486 : vector<2x128xf32>
    %490 = vector.extract_strided_slice %489 {offsets = [0, 0], sizes = [2, 32], strides = [1, 1]} : vector<2x128xf32> to vector<2x32xf32>
    %491 = arith.negf %490 : vector<2x32xf32>
    %492 = math.exp %491 : vector<2x32xf32>
    %cst_143 = arith.constant 1.000000e+00 : f32
    %493 = vector.broadcast %cst_143 : f32 to vector<2x32xf32>
    %494 = arith.addf %493, %492 : vector<2x32xf32>
    %495 = arith.divf %493, %494 : vector<2x32xf32>
    %496 = vector.extract_strided_slice %489 {offsets = [0, 32], sizes = [2, 32], strides = [1, 1]} : vector<2x128xf32> to vector<2x32xf32>
    %497 = arith.negf %496 : vector<2x32xf32>
    %498 = math.exp %497 : vector<2x32xf32>
    %cst_144 = arith.constant 1.000000e+00 : f32
    %499 = vector.broadcast %cst_144 : f32 to vector<2x32xf32>
    %500 = arith.addf %499, %498 : vector<2x32xf32>
    %501 = arith.divf %499, %500 : vector<2x32xf32>
    %502 = vector.extract_strided_slice %489 {offsets = [0, 64], sizes = [2, 32], strides = [1, 1]} : vector<2x128xf32> to vector<2x32xf32>
    %503 = math.tanh %502 : vector<2x32xf32>
    %504 = vector.extract_strided_slice %489 {offsets = [0, 96], sizes = [2, 32], strides = [1, 1]} : vector<2x128xf32> to vector<2x32xf32>
    %505 = arith.negf %504 : vector<2x32xf32>
    %506 = math.exp %505 : vector<2x32xf32>
    %cst_145 = arith.constant 1.000000e+00 : f32
    %507 = vector.broadcast %cst_145 : f32 to vector<2x32xf32>
    %508 = arith.addf %507, %506 : vector<2x32xf32>
    %509 = arith.divf %507, %508 : vector<2x32xf32>
    %510 = arith.mulf %501, %450 : vector<2x32xf32>
    %511 = arith.mulf %495, %503 : vector<2x32xf32>
    %512 = arith.addf %510, %511 : vector<2x32xf32>
    %513 = math.tanh %512 : vector<2x32xf32>
    %514 = arith.mulf %509, %513 : vector<2x32xf32>
    %515 = arith.truncf %485 : vector<2x32xf32> to vector<2x32xbf16>
    %c14_146 = arith.constant 14 : index
    %c0_147 = arith.constant 0 : index
    %516 = vector.load %arg9[%c14_146, %c0_147] : memref<16x32xbf16, #tpu.memory_space<vmem>>, vector<2x32xbf16>
    tpu.vector_store %arg9[%c14_146, %c0_147], %515 {strides = array<i32>} : memref<16x32xbf16, #tpu.memory_space<vmem>>, vector<2x32xbf16>,
    %517 = arith.truncf %514 : vector<2x32xf32> to vector<2x32xbf16>
    %c0_148 = arith.constant 0 : index
    %c0_149 = arith.constant 0 : index
    %518 = vector.load %arg10[%c0_148, %c0_149] : memref<16x32xbf16, #tpu.memory_space<vmem>>, vector<2x32xbf16>
    tpu.vector_store %arg10[%c0_148, %c0_149], %517 {strides = array<i32>} : memref<16x32xbf16, #tpu.memory_space<vmem>>, vector<2x32xbf16>,
    %c0_150 = arith.constant 0 : index
    %c0_151 = arith.constant 0 : index
    %519 = vector.load %arg17[%c0_150, %c0_151] : memref<2x32xf32, #tpu.memory_space<vmem>>, vector<2x32xf32>
    tpu.vector_store %arg17[%c0_150, %c0_151], %485 {strides = array<i32>} : memref<2x32xf32, #tpu.memory_space<vmem>>, vector<2x32xf32>,
    %c0_152 = arith.constant 0 : index
    %c0_153 = arith.constant 0 : index
    %520 = vector.load %arg18[%c0_152, %c0_153] : memref<2x32xf32, #tpu.memory_space<vmem>>, vector<2x32xf32>
    tpu.vector_store %arg18[%c0_152, %c0_153], %483 {strides = array<i32>} : memref<2x32xf32, #tpu.memory_space<vmem>>, vector<2x32xf32>,
    %c0_154 = arith.constant 0 : index
    %c0_155 = arith.constant 0 : index
    %521 = vector.load %arg19[%c0_154, %c0_155] : memref<2x32xf32, #tpu.memory_space<vmem>>, vector<2x32xf32>
    tpu.vector_store %arg19[%c0_154, %c0_155], %514 {strides = array<i32>} : memref<2x32xf32, #tpu.memory_space<vmem>>, vector<2x32xf32>,
    %c0_156 = arith.constant 0 : index
    %c0_157 = arith.constant 0 : index
    %522 = vector.load %arg20[%c0_156, %c0_157] : memref<2x32xf32, #tpu.memory_space<vmem>>, vector<2x32xf32>
    tpu.vector_store %arg20[%c0_156, %c0_157], %512 {strides = array<i32>} : memref<2x32xf32, #tpu.memory_space<vmem>>, vector<2x32xf32>,
    %c0_i32_158 = arith.constant 0 : i32
    %523 = arith.cmpi eq, %arg0, %c0_i32_158 : i32
    %524 = arith.extui %523 : i1 to i32
    %c0_i32_159 = arith.constant 0 : i32
    %525 = arith.cmpi ne, %524, %c0_i32_159 : i32
    scf.if %525 {
      %c0_160 = arith.constant 0 : index
      %c0_161 = arith.constant 0 : index
      %526 = vector.load %arg11[%c0_160, %c0_161] : memref<2x32xf32, #tpu.memory_space<vmem>>, vector<2x32xf32>
      tpu.vector_store %arg11[%c0_160, %c0_161], %485 {strides = array<i32>} : memref<2x32xf32, #tpu.memory_space<vmem>>, vector<2x32xf32>,
      %c0_162 = arith.constant 0 : index
      %c0_163 = arith.constant 0 : index
      %527 = vector.load %arg12[%c0_162, %c0_163] : memref<2x32xf32, #tpu.memory_space<vmem>>, vector<2x32xf32>
      tpu.vector_store %arg12[%c0_162, %c0_163], %514 {strides = array<i32>} : memref<2x32xf32, #tpu.memory_space<vmem>>, vector<2x32xf32>,
      %c0_164 = arith.constant 0 : index
      %c0_165 = arith.constant 0 : index
      %528 = vector.load %arg13[%c0_164, %c0_165] : memref<2x32xf32, #tpu.memory_space<vmem>>, vector<2x32xf32>
      tpu.vector_store %arg13[%c0_164, %c0_165], %483 {strides = array<i32>} : memref<2x32xf32, #tpu.memory_space<vmem>>, vector<2x32xf32>,
      %c0_166 = arith.constant 0 : index
      %c0_167 = arith.constant 0 : index
      %529 = vector.load %arg14[%c0_166, %c0_167] : memref<2x32xf32, #tpu.memory_space<vmem>>, vector<2x32xf32>
      tpu.vector_store %arg14[%c0_166, %c0_167], %512 {strides = array<i32>} : memref<2x32xf32, #tpu.memory_space<vmem>>, vector<2x32xf32>,
    } else {
    }
    return
  }
  func.func @transform_0(%arg0: i32) -> (i32, i32) {
    %c0_i32 = arith.constant 0 : i32
    %c0_i32_0 = arith.constant 0 : i32
    return %arg0, %c0_i32 : i32, i32
  }
  func.func @transform_1(%arg0: i32) -> (i32, i32) {
    %c0_i32 = arith.constant 0 : i32
    %0 = arith.subi %c0_i32, %arg0 : i32
    %c0_i32_0 = arith.constant 0 : i32
    %c0_i32_1 = arith.constant 0 : i32
    return %0, %c0_i32_0 : i32, i32
  }
  func.func @transform_2(%arg0: i32) -> (i32, i32) {
    %c0_i32 = arith.constant 0 : i32
    %c0_i32_0 = arith.constant 0 : i32
    %c0_i32_1 = arith.constant 0 : i32
    return %c0_i32, %c0_i32_0 : i32, i32
  }
  func.func @transform_3(%arg0: i32) -> (i32, i32) {
    %c0_i32 = arith.constant 0 : i32
    %c0_i32_0 = arith.constant 0 : i32
    %c0_i32_1 = arith.constant 0 : i32
    return %c0_i32, %c0_i32_0 : i32, i32
  }
  func.func @transform_4(%arg0: i32) -> (i32, i32) {
    %c0_i32 = arith.constant 0 : i32
    %c0_i32_0 = arith.constant 0 : i32
    %c0_i32_1 = arith.constant 0 : i32
    return %c0_i32, %c0_i32_0 : i32, i32
  }
  func.func @transform_5(%arg0: i32) -> (i32, i32) {
    %c0_i32 = arith.constant 0 : i32
    %c0_i32_0 = arith.constant 0 : i32
    %c0_i32_1 = arith.constant 0 : i32
    return %c0_i32, %c0_i32_0 : i32, i32
  }
  func.func @transform_6(%arg0: i32) -> (i32, i32) {
    %c0_i32 = arith.constant 0 : i32
    %c0_i32_0 = arith.constant 0 : i32
    %c0_i32_1 = arith.constant 0 : i32
    return %c0_i32, %c0_i32_0 : i32, i32
  }
  func.func @transform_7(%arg0: i32) -> (i32, i32) {
    %c0_i32 = arith.constant 0 : i32
    %c0_i32_0 = arith.constant 0 : i32
    %c0_i32_1 = arith.constant 0 : i32
    return %c0_i32, %c0_i32_0 : i32, i32
  }
  func.func @transform_8(%arg0: i32) -> (i32, i32) {
    %c0_i32 = arith.constant 0 : i32
    %c0_i32_0 = arith.constant 0 : i32
    return %arg0, %c0_i32 : i32, i32
  }
  func.func @transform_9(%arg0: i32) -> (i32, i32) {
    %c0_i32 = arith.constant 0 : i32
    %0 = arith.subi %c0_i32, %arg0 : i32
    %c0_i32_0 = arith.constant 0 : i32
    %c0_i32_1 = arith.constant 0 : i32
    return %0, %c0_i32_0 : i32, i32
  }
  func.func @transform_10(%arg0: i32) -> (i32, i32) {
    %c0_i32 = arith.constant 0 : i32
    %c0_i32_0 = arith.constant 0 : i32
    %c0_i32_1 = arith.constant 0 : i32
    return %c0_i32, %c0_i32_0 : i32, i32
  }
  func.func @transform_11(%arg0: i32) -> (i32, i32) {
    %c0_i32 = arith.constant 0 : i32
    %c0_i32_0 = arith.constant 0 : i32
    %c0_i32_1 = arith.constant 0 : i32
    return %c0_i32, %c0_i32_0 : i32, i32
  }
  func.func @transform_12(%arg0: i32) -> (i32, i32) {
    %c0_i32 = arith.constant 0 : i32
    %c0_i32_0 = arith.constant 0 : i32
    %c0_i32_1 = arith.constant 0 : i32
    return %c0_i32, %c0_i32_0 : i32, i32
  }
  func.func @transform_13(%arg0: i32) -> (i32, i32) {
    %c0_i32 = arith.constant 0 : i32
    %c0_i32_0 = arith.constant 0 : i32
    %c0_i32_1 = arith.constant 0 : i32
    return %c0_i32, %c0_i32_0 : i32, i32
  }
}

</mosaic_0001>

<bundles_post_ra>
// kernel: tpu_custom_call.1
= control target key start
LH: loop header
LB: loop body
LE: loop exit
PB: predicated region body
PF: predicated region fallthrough
CT: control target
= control target key end

     0   :  { %19 = vsyncpa [#allocation9], 0  ;;  %s3019_s0 = inlined_call_operand.hbm [shape: bf16[16,16], index: 0, kind: input, shape index: {}]   ;;  %s3020_s1 = inlined_call_operand.hbm [shape: bf16[16,16], index: 1, kind: input, shape index: {}]   ;;  %s3021_s2 = inlined_call_operand.hbm [shape: bf16[16,128], index: 2, kind: input, shape index: {}]   ;;  %s3022_s3 = inlined_call_operand.hbm [shape: bf16[16,128], index: 3, kind: input, shape index: {}]   ;;  %s3023_s4 = inlined_call_operand.hbm [shape: bf16[32,128], index: 4, kind: input, shape index: {}]   ;;  %s3024_s5 = inlined_call_operand.vmem [shape: bf16[32,128], index: 5, kind: input, shape index: {}]   ;;  %s3025_s6 = inlined_call_operand.vmem [shape: f32[1,128], index: 6, kind: input, shape index: {}]   ;;  %s3026_s7 = inlined_call_operand.vmem [shape: f32[1,128], index: 7, kind: input, shape index: {}]   ;;  %s3027_s8 = inlined_call_operand.hbm [shape: bf16[16,32], index: 8, kind: output, shape index: {0}]   ;;  %s3028_s9 = inlined_call_operand.hbm [shape: bf16[16,32], index: 9, kind: output, shape index: {1}]   ;;  %s3029_s10 = inlined_call_operand.hbm [shape: f32[2,32], index: 10, kind: output, shape index: {2}]   ;;  %s3030_s11 = inlined_call_operand.hbm [shape: f32[2,32], index: 11, kind: output, shape index: {3}]   ;;  %s3031_s12 = inlined_call_operand.hbm [shape: f32[2,32], index: 12, kind: output, shape index: {4}]   ;;  %s3032_s13 = inlined_call_operand.hbm [shape: f32[2,32], index: 13, kind: output, shape index: {5}]  }
   0x1   :  { %20 = vsyncpa [#allocation12], 0 }
   0x2   :  { %21 = vsyncpa [#allocation15], 0 }
   0x3   :  { %22 = vsyncpa [#allocation10], 0 }
   0x4   :  { %23 = vsyncpa [#allocation19], 0 }
   0x5   :  { %24 = vsyncpa [#allocation22], 0 }
   0x6   :  { %25 = vsyncpa [#allocation25], 0  ;;  %s2371_s25 = smov [#allocation11]   ;;  %s2372_s27 = smov [#allocation14]  }
   0x7   :  { %s47_s26 = sshll.u32 %s2371_s25, 4  ;;  %s71_s28 = sshll.u32 %s2372_s27, 4  ;;  %s48_s26 = int_to_ptr.vmem [resolvable:$true] %s47_s26  ;;  %s2458_s28 = int_to_ptr.vmem [resolvable:$true] %s71_s28 }
   0x8   :  { %s2115_s14 = scalar_lea.hbm %s3020_s1, 128 }
   0x9   :  { %p2116_p0 = scmp.ne.s32.totalorder %s3020_s1, %s2115_s14  ;;  %p2119_p1 = scmp.lt.u32.totalorder %s2115_s14, %s3020_s1 }
   0xb   :  { %p2121_p2 = pnand %p2119_p1, %p2116_p0 }
   0xd   :  { %2124 = shalt.err (!%p2121_p2)
}
   0xe   :  { %s2125_s19 = scalar_lea.vmem %s48_s26, 128  ;;  %p2130_p4 = scmp.lt.s32.totalorder %s48_s26, %s48_s26 }
   0xf   :  { %p2126_p3 = scmp.ne.s32.totalorder %s48_s26, %s2125_s19  ;;  %p2131_p5 = scmp.lt.s32.totalorder %s2125_s19, %s2125_s19 }
  0x11   :  { %p2132_p6 = por %p2131_p5, %p2130_p4 }
  0x13   :  { %p2133_p7 = pnand %p2132_p6, %p2126_p3 }
  0x15   :  { %2136 = shalt.err (!%p2133_p7)
}
  0x16   :  { %s2373_s20 = smov 64   ;;  %s2374_s21 = smov 4  }
  0x17   :  { %53 = dma.hbm_to_vmem [thread:$0]  %s3020_s1, 128, %s48_s26, [#allocation12], %s2373_s20, %s2373_s20, %s2374_s21  }
  0x18   :  { %s2137_s27 = scalar_lea.hbm %s3022_s3, 128 }
  0x19   :  { %p2138_p8 = scmp.ne.s32.totalorder %s3022_s3, %s2137_s27  ;;  %p2141_p9 = scmp.lt.u32.totalorder %s2137_s27, %s3022_s3 }
  0x1b   :  { %p2143_p10 = pnand %p2141_p9, %p2138_p8 }
  0x1d   :  { %2146 = shalt.err (!%p2143_p10)
}
  0x1e   :  { %s2147_s16 = scalar_lea.vmem %s2458_s28, 128  ;;  %p2152_p12 = scmp.lt.s32.totalorder %s2458_s28, %s2458_s28 }
  0x1f   :  { %p2148_p11 = scmp.ne.s32.totalorder %s2458_s28, %s2147_s16  ;;  %p2153_p13 = scmp.lt.s32.totalorder %s2147_s16, %s2147_s16 }
  0x21   :  { %p2154_p0 = por %p2153_p13, %p2152_p12 }
  0x23   :  { %p2155_p1 = pnand %p2154_p0, %p2148_p11 }
  0x25   :  { %2158 = shalt.err (!%p2155_p1)
}
  0x26   :  { %77 = dma.hbm_to_vmem [thread:$0]  %s3022_s3, 128, %s2458_s28, [#allocation15], %s2373_s20, %s2373_s20, %s2374_s21  }
  0x27   :  { %s2375_s17 = smov [#allocation8]   ;;  %s2376_s19 = smov [#allocation13]  }
  0x28   :  { %s31_s18 = sshll.u32 %s2375_s17, 4  ;;  %s59_s22 = sshll.u32 %s2376_s19, 4  ;;  %s32_s18 = int_to_ptr.vmem [resolvable:$true] %s31_s18  ;;  %s2495_s22 = int_to_ptr.vmem [resolvable:$true] %s59_s22 }
  0x29   :  { %s2159_s25 = scalar_lea.hbm %s3019_s0, 128 }
  0x2a   :  { %p2160_p2 = scmp.ne.s32.totalorder %s3019_s0, %s2159_s25  ;;  %p2163_p3 = scmp.lt.u32.totalorder %s2159_s25, %s3019_s0 }
  0x2c   :  { %p2165_p4 = pnand %p2163_p3, %p2160_p2 }
  0x2e   :  { %2168 = shalt.err (!%p2165_p4)
}
  0x2f   :  { %s2169_s3 = scalar_lea.vmem %s32_s18, 128  ;;  %p2174_p6 = scmp.lt.s32.totalorder %s32_s18, %s32_s18 }
  0x30   :  { %p2170_p5 = scmp.ne.s32.totalorder %s32_s18, %s2169_s3  ;;  %p2175_p7 = scmp.lt.s32.totalorder %s2169_s3, %s2169_s3 }
  0x32   :  { %p2176_p8 = por %p2175_p7, %p2174_p6 }
  0x34   :  { %p2177_p9 = pnand %p2176_p8, %p2170_p5 }
  0x36   :  { %2180 = shalt.err (!%p2177_p9)
}
  0x37   :  { %37 = dma.hbm_to_vmem [thread:$0]  %s3019_s0, 128, %s32_s18, [#allocation9], %s2373_s20, %s2373_s20, %s2374_s21  }
  0x38   :  { %s2181_s26 = scalar_lea.hbm %s3021_s2, 128 }
  0x39   :  { %p2182_p10 = scmp.ne.s32.totalorder %s3021_s2, %s2181_s26  ;;  %p2185_p11 = scmp.lt.u32.totalorder %s2181_s26, %s3021_s2 }
  0x3b   :  { %p2187_p12 = pnand %p2185_p11, %p2182_p10 }
  0x3d   :  { %2190 = shalt.err (!%p2187_p12)
}
  0x3e   :  { %s2191_s25 = scalar_lea.vmem %s2495_s22, 128  ;;  %p2196_p0 = scmp.lt.s32.totalorder %s2495_s22, %s2495_s22 }
  0x3f   :  { %p2192_p13 = scmp.ne.s32.totalorder %s2495_s22, %s2191_s25  ;;  %p2197_p1 = scmp.lt.s32.totalorder %s2191_s25, %s2191_s25 }
  0x41   :  { %p2198_p2 = por %p2197_p1, %p2196_p0 }
  0x43   :  { %p2199_p3 = pnand %p2198_p2, %p2192_p13 }
  0x45   :  { %2202 = shalt.err (!%p2199_p3)
}
  0x46   :  { %65 = dma.hbm_to_vmem [thread:$0]  %s3021_s2, 128, %s2495_s22, [#allocation12], %s2373_s20, %s2373_s20, %s2374_s21  }
  0x47   :  { %s2377_s27 = smov [#allocation16]   ;;  %s2203_s3 = scalar_lea.hbm %s3023_s4, 256 }
  0x48   :  { %s83_s29 = sshll.u32 %s2377_s27, 4  ;;  %p2204_p4 = scmp.ne.s32.totalorder %s3023_s4, %s2203_s3  ;;  %s84_s29 = int_to_ptr.vmem [resolvable:$true] %s83_s29 }
  0x49   :  { %p2207_p5 = scmp.lt.u32.totalorder %s2203_s3, %s3023_s4 }
  0x4b   :  { %p2209_p6 = pnand %p2207_p5, %p2204_p4 }
  0x4d   :  { %2212 = shalt.err (!%p2209_p6)
}
  0x4e   :  { %s2213_s26 = scalar_lea.vmem %s84_s29, 256  ;;  %p2218_p8 = scmp.lt.s32.totalorder %s84_s29, %s84_s29 }
  0x4f   :  { %p2214_p7 = scmp.ne.s32.totalorder %s84_s29, %s2213_s26  ;;  %p2219_p9 = scmp.lt.s32.totalorder %s2213_s26, %s2213_s26 }
  0x51   :  { %p2220_p10 = por %p2219_p9, %p2218_p8 }
  0x53   :  { %p2221_p11 = pnand %p2220_p10, %p2214_p7 }
  0x55   :  { %2224 = shalt.err (!%p2221_p11)
}
  0x56   :  { %89 = dma.hbm_to_vmem [thread:$0]  %s3023_s4, 256, %s84_s29, [#allocation15], %s2373_s20, %s2373_s20, %s2374_s21  }
  0x57   :  { %2357 = dma.done.wait [#allocation9], 128  }
  0x58   :  { %2358 = vsyncadd [#allocation9], 4294967168 }
  0x59   :  { %2359 = dma.done.wait [#allocation12], 256  }
  0x5a   :  { %2360 = vsyncadd [#allocation12], 4294967040 }
  0x5b   :  { %2361 = dma.done.wait [#allocation15], 384  }
  0x5c   :  { %2362 = vsyncadd [#allocation15], 4294966912  ;;  %vm120_vm0 = vcmask 254976   ;;  %v2378_v0 = vmov 0.0   ;;  %vm2379_vm1 = vmmov 0   ;;  %v1979_v1 = vld [vmem:[#allocation13] sm:$0xff]  }
  0x5d   :  { %1822 = vmatprep.subr.bf16.mxu0 %v2378_v0  ;;  %1828 = vmatprep.subr.bf16.mxu1 %v2378_v0  ;;  %121 = vst.msk [vmem:[#allocation4] sm:$0x3] %vm120_vm0, %v2378_v0  ;;  %122 = vst.msk [vmem:[#allocation5] sm:$0x3] %vm120_vm0, %v2378_v0  ;;  %v1980_v2 = vld [vmem:[#allocation14] sm:$0xff]   ;;  %v1981_v3 = vld [vmem:[#allocation8] sm:$0xff]  }
  0x5e   :  { %123 = vst.msk [vmem:[#allocation6] sm:$0x3] %vm120_vm0, %v2378_v0  ;;  %124 = vst.msk [vmem:[#allocation7] sm:$0x3] %vm120_vm0, %v2378_v0  ;;  %1824 = vmatprep.mubr.msk.bf16.mxu0 %vm2379_vm1, %v2378_v0  ;;  %1830 = vmatprep.mubr.msk.bf16.mxu1 %vm2379_vm1, %v2378_v0  ;;  %vm147_vm2 = vcmask 130048   ;;  %v1982_v4 = vld [vmem:[#allocation11] sm:$0xff]  }
  0x5f   :  { %1823 = vmatpush3.bf16.msra.mxu0 %v1979_v1  ;;  %1829 = vmatpush3.bf16.msra.mxu1 %v1980_v2  ;;  %v2562_v5 = vld [vmem:[#allocation16] sm:$0xff]   ;;  %v2568_v6 = vld [vmem:[%s3024_s5] sm:$0xff]   ;;  %v2581_v9 = vld [vmem:[%s3024_s5 + $0x8] sm:$0xff]   ;;  %s2380_s24 = smov 32   ;;  %vm288_vm3 = vcmask 261120   ;;  %vm462_vm4 = vcmask 257027  }
  0x60   :  { %1834 = vmatprep.subr.bf16.mxu0 %v2378_v0  ;;  %1842 = vmatprep.subr.bf16.mxu1 %v2378_v0  ;;  %v2571_v7 = vld [vmem:[#allocation16 + $0x8] sm:$0xff]   ;;  %vm622_vm5 = vcmask 256002   ;;  %vm612_vm6 = vcmask 254977   ;;  %vm452_vm7 = vcmask 253952   ;;  %s2383_s29 = smov [#allocation21]   ;;  %s2384_s14 = smov [#allocation17]  }
  0x61   :  { %v1694_v15 = vld [vmem:[%s3025_s6] ss:$0 sm:$0xff]  ;;  %s2381_s6 = smov 96   ;;  %s1641_s30 = sshll.u32 %s2383_s29, 4  ;;  %s1642_s30 = int_to_ptr.vmem [resolvable:$true] %s1641_s30 }
  0x62   :  { %1825 = vmatmul.mubr.msk.bf16.vlgmr.msra.gmra.mrb[0].mxu0 %vm147_vm2, %v1981_v3  ;;  %1831 = vmatmul.mubr.msk.bf16.vlgmr.msra.gmra.mrb[0].mxu1 %vm147_vm2, %v1982_v4  ;;  %v1698_v16 = vld [vmem:[%s3026_s7] ss:$0 sm:$0xff]  ;;  %s2382_s7 = smov [#allocation18]   ;;  %s1602_s3 = sshll.u32 %s2384_s14, 4  ;;  %s2899_s3 = int_to_ptr.vmem [resolvable:$true] %s1602_s3 }
  0x63   :  { %1835 = vmatpush3.bf16.msra.mxu0 %v2562_v5  ;;  %1843 = vmatpush3.bf16.msra.mxu1 %v2568_v6  ;;  %s1618_s27 = sshll.u32 %s2382_s7, 4  ;;  %s2385_s28 = smov [#allocation20]   ;;  %s2895_s27 = int_to_ptr.vmem [resolvable:$true] %s1618_s27 }
  0x64   :  { %1836 = vmatprep.subr.bf16.mxu0 %v2378_v0  ;;  %v270_v8 = vld [vmem:[#allocation4] sm:$0x3]  ;;  %1838 = vmatprep.mubr.msk.bf16.mxu0 %vm2379_vm1, %v2378_v0  ;;  %v271_v11 = vld [vmem:[#allocation5] sm:$0x3]  ;;  %s1631_s15 = sshll.u32 %s2385_s28, 4  ;;  %s2386_s16 = smov [#allocation24]   ;;  %s2901_s15 = int_to_ptr.vmem [resolvable:$true] %s1631_s15 }
  0x65   :  { %1844 = vmatprep.subr.bf16.mxu1 %v2378_v0  ;;  %v272_v10 = vld [vmem:[#allocation6] sm:$0x3]  ;;  %v275_v12 = vpack.c.bf16 %v270_v8, %v270_v8  ;;  %1846 = vmatprep.mubr.msk.bf16.mxu1 %vm2379_vm1, %v2378_v0  ;;  %v273_v14 = vld [vmem:[#allocation7] sm:$0x3]  ;;  %s1661_s1 = sshll.u32 %s2386_s16, 4  ;;  %s2225_s26 = scalar_lea.vmem %s1642_s30, 32  ;;  %s2918_s1 = int_to_ptr.vmem [resolvable:$true] %s1661_s1 }
  0x66   :  { %340 = vrot.lane.b32.xlu1 %v271_v11, %s2380_s24  ;;  %v361_v13 = vpack.c.bf16 %v272_v10, %v272_v10  ;;  %p2226_p12 = scmp.ne.s32.totalorder %s1642_s30, %s2225_s26  ;;  %p2230_p13 = scmp.lt.s32.totalorder %s1642_s30, %s1642_s30 }
  0x67   :  { %1837 = vmatpush3.bf16.msra.mxu0 %v2571_v7  ;;  %1845 = vmatpush3.bf16.msra.mxu1 %v2581_v9  ;;  %p2231_p0 = scmp.lt.s32.totalorder %s2225_s26, %s2225_s26 }
  0x68   :  { %1850 = vmatprep.subr.bf16.mxu0 %v2378_v0  ;;  %1858 = vmatprep.subr.bf16.mxu1 %v2378_v0 }
  0x69   :  { %p2232_p1 = por %p2231_p0, %p2230_p13 }
  0x6a   :  { %1839 = vmatmul.mubr.msk.bf16.vlgmr.msra.gmra.mrb[4].mxu0 %vm288_vm3, %v275_v12  ;;  %425 = vrot.lane.b32.xlu1 %v273_v14, %s2380_s24 }
  0x6b   :  { %1847 = vmatmul.mubr.msk.bf16.vlgmr.msra.gmra.mrb[4].mxu1 %vm288_vm3, %v361_v13  ;;  %1851 = vmatpush3.bf16.msra.mxu0 %v2562_v5  ;;  %p2233_p2 = pnand %p2232_p1, %p2226_p12 }
  0x6c   :  { %1852 = vmatprep.subr.bf16.mxu0 %v2378_v0  ;;  %1859 = vmatpush3.bf16.msra.mxu1 %v2568_v6 }
  0x6d   :  { %1854 = vmatprep.mubr.msk.bf16.mxu0 %vm2379_vm1, %v2378_v0  ;;  %1860 = vmatprep.subr.bf16.mxu1 %v2378_v0 }
  0x6e   :  { %1862 = vmatprep.mubr.msk.bf16.mxu1 %vm2379_vm1, %v2378_v0 }
  0x6f   :  { %1853 = vmatpush3.bf16.msra.mxu0 %v2571_v7 }
  0x70   :  { %1861 = vmatpush3.bf16.msra.mxu1 %v2581_v9  ;;  %1866 = vmatprep.subr.bf16.mxu0 %v2378_v0 }
  0x71   :  { %1874 = vmatprep.subr.bf16.mxu1 %v2378_v0 }
  0xd8   :  { %v341_v55 = vpop.permute.xlu1 %340 }
  0xdc   :  { %v426_v57 = vpop.permute.xlu1 %425 }
 0x135   :  { %v185_v17 = vpop.f32.mrb[0].mxu0  ;;  %v253_v19 = vpop.f32.mrb[0].mxu1 }
 0x136   :  { %v186_v18 = vadd.f32 %v1694_v15, %v185_v17  ;;  %v1826_v20 = vpop.f32.mrb[1].mxu0  ;;  %v254_v21 = vadd.f32 %v1698_v16, %v253_v19  ;;  %v1832_v22 = vpop.f32.mrb[1].mxu1 }
 0x137   :  { %v188_v23 = vpop.f32.mrb[2].mxu0  ;;  %v256_v25 = vpop.f32.mrb[2].mxu1 }
 0x138   :  { %192 = vst [vmem:[#allocation2] sm:$0xff] %v186_v18  ;;  %v189_v24 = vadd.f32 %v1694_v15, %v188_v23  ;;  %v1827_v26 = vpop.f32.mrb[3].mxu0  ;;  %260 = vst [vmem:[#allocation3] sm:$0xff] %v254_v21  ;;  %v257_v27 = vadd.f32 %v1698_v16, %v256_v25  ;;  %v1833_v28 = vpop.f32.mrb[3].mxu1 }
 0x13a   :  { %193 = vst [vmem:[#allocation2 + $0x8] sm:$0xff] %v189_v24  ;;  %261 = vst [vmem:[#allocation3 + $0x8] sm:$0xff] %v257_v27 }
 0x13d   :  { %v326_v29 = vpop.f32.mrb[4].mxu0 }
 0x13e   :  { %v1840_v30 = vpop.f32.mrb[5].mxu0  ;;  %v411_v31 = vpop.f32.mrb[4].mxu1 }
 0x13f   :  { %v274_v32 = vld [vmem:[#allocation2] sm:$0x3]  ;;  %v329_v33 = vpop.f32.mrb[6].mxu0  ;;  %v1848_v34 = vpop.f32.mrb[5].mxu1  ;;  %v464_v14 = vld [vmem:[#allocation2 + $0x2] sm:$0x3] }
 0x140   :  { %v327_v35 = vadd.f32 %v326_v29, %v274_v32  ;;  %v1841_v36 = vpop.f32.mrb[7].mxu0  ;;  %v414_v37 = vpop.f32.mrb[6].mxu1 }
 0x141   :  { %v1849_v38 = vpop.f32.mrb[7].mxu1  ;;  %v360_v39 = vld [vmem:[#allocation3 + $0xe] sm:$0x3]  ;;  %v534_v20 = vld [vmem:[#allocation3 + $0xc] sm:$0x3] }
 0x142   :  { %1987 = vtanh.f32 %v327_v35  ;;  %v412_v40 = vadd.f32 %v411_v31, %v360_v39  ;;  %v1705_v43 = vmul.f32 -1.442695, %v327_v35 }
 0x144   :  { %1989 = vtanh.f32 %v412_v40  ;;  %v1709_v44 = vmul.f32 -1.442695, %v412_v40 }
 0x145   :  { %1991 = vpow2.f32 %v1705_v43 }
 0x146   :  { %1993 = vpow2.f32 %v1709_v44 }
 0x14c   :  { %v1988_v41 = vpop.eup %1987 }
 0x14d   :  { %345 = vrot.lane.b32.xlu0 %v1988_v41, %s2373_s20 }
 0x14e   :  { %v1990_v42 = vpop.eup %1989 }
 0x14f   :  { %v1992_v45 = vpop.eup %1991 }
 0x150   :  { %v335_v46 = vadd.f32 1.0, %v1992_v45  ;;  %v1994_v47 = vpop.eup %1993 }
 0x151   :  { %430 = vrot.lane.b32.xlu0 %v1990_v42, %s2373_s20  ;;  %v420_v48 = vadd.f32 1.0, %v1994_v47 }
 0x152   :  { %1995 = vrcp.f32 %v335_v46 }
 0x153   :  { %1997 = vrcp.f32 %v420_v48 }
 0x15c   :  { %v1996_v49 = vpop.eup %1995 }
 0x15d   :  { %v1998_v52 = vpop.eup %1997  ;;  %v343_v56 = vmul.f32 %v1996_v49, %v341_v55 }
 0x15e   :  { %v428_v60 = vmul.f32 %v1998_v52, %v426_v57 }
 0x1bf   :  { %v346_v50 = vpop.permute.xlu0 %345 }
 0x1c0   :  { %v348_v51 = vmul.f32 %v1996_v49, %v346_v50 }
 0x1c2   :  { %350 = vrot.lane.b32.xlu0 %v348_v51, %s2380_s24 }
 0x1c3   :  { %v431_v53 = vpop.permute.xlu0 %430 }
 0x1c4   :  { %v433_v54 = vmul.f32 %v1998_v52, %v431_v53 }
 0x1c6   :  { %435 = vrot.lane.b32.xlu1 %v433_v54, %s2380_s24 }
 0x234   :  { %v351_v58 = vpop.permute.xlu0 %350 }
 0x235   :  { %v2615_v59 = vadd.f32 %v351_v58, %v343_v56  ;;  %v624_v56 = vld [vmem:[#allocation2 + $0x4] sm:$0x3] }
 0x237   :  { %1999 = vtanh.f32 %v2615_v59 }
 0x238   :  { %v436_v61 = vpop.permute.xlu1 %435 }
 0x239   :  { %v2618_v62 = vadd.f32 %v436_v61, %v428_v60 }
 0x23b   :  { %2001 = vtanh.f32 %v2618_v62 }
 0x241   :  { %v2000_v63 = vpop.eup %1999 }
 0x242   :  { %356 = vrot.lane.b32.xlu0 %v2000_v63, %s2373_s20 }
 0x245   :  { %v2002_v1 = vpop.eup %2001 }
 0x246   :  { %441 = vrot.lane.b32.xlu1 %v2002_v1, %s2373_s20 }
 0x2b4   :  { %v357_v2 = vpop.permute.xlu0 %356 }
 0x2b5   :  { %v359_v3 = vmul.f32 %v1996_v49, %v357_v2 }
 0x2b7   :  { %v2623_v4 = vpack.c.bf16 %v359_v3, %v359_v3 }
 0x2b8   :  { %v442_v8 = vpop.permute.xlu1 %441 }
 0x2b9   :  { %v444_v10 = vmul.f32 %v1998_v52, %v442_v8  ;;  %465 = vrot.lane.b32.xlu0 %v2623_v4, %s2380_s24 }
 0x2bb   :  { %v2627_v11 = vpack.c.bf16 %v444_v10, %v444_v10 }
 0x2bd   :  { %535 = vrot.lane.b32.xlu1 %v2627_v11, %s2380_s24 }
 0x32b   :  { %v466_v12 = vpop.permute.xlu0 %465 }
 0x32c   :  { %1855 = vmatmul.mubr.msk.bf16.vlgmr.msra.gmra.mrb[8].mxu0 %vm288_vm3, %v466_v12 }
 0x32d   :  { %1867 = vmatpush3.bf16.msra.mxu0 %v2562_v5  ;;  %1870 = vmatprep.mubr.msk.bf16.mxu0 %vm2379_vm1, %v2378_v0 }
 0x32e   :  { %1868 = vmatprep.subr.bf16.mxu0 %v2378_v0 }
 0x32f   :  { %v536_v13 = vpop.permute.xlu1 %535 }
 0x330   :  { %1863 = vmatmul.mubr.msk.bf16.vlgmr.msra.gmra.mrb[8].mxu1 %vm288_vm3, %v536_v13 }
 0x331   :  { %1875 = vmatpush3.bf16.msra.mxu1 %v2568_v6  ;;  %1869 = vmatpush3.bf16.msra.mxu0 %v2571_v7 }
 0x332   :  { %1876 = vmatprep.subr.bf16.mxu1 %v2378_v0  ;;  %1878 = vmatprep.mubr.msk.bf16.mxu1 %vm2379_vm1, %v2378_v0 }
 0x333   :  { %1882 = vmatprep.subr.bf16.mxu0 %v2378_v0 }
 0x335   :  { %1877 = vmatpush3.bf16.msra.mxu1 %v2581_v9 }
 0x336   :  { %1890 = vmatprep.subr.bf16.mxu1 %v2378_v0 }
 0x3ff   :  { %v504_v15 = vpop.f32.mrb[8].mxu0 }
 0x400   :  { %v505_v16 = vadd.f32 %v504_v15, %v464_v14  ;;  %v1856_v17 = vpop.f32.mrb[9].mxu0 }
 0x401   :  { %v507_v18 = vpop.f32.mrb[10].mxu0 }
 0x402   :  { %2003 = vtanh.f32 %v505_v16  ;;  %v1857_v19 = vpop.f32.mrb[11].mxu0  ;;  %v1713_v28 = vmul.f32 -1.442695, %v505_v16 }
 0x403   :  { %v574_v21 = vpop.f32.mrb[8].mxu1 }
 0x404   :  { %v575_v22 = vadd.f32 %v574_v21, %v534_v20  ;;  %v1864_v23 = vpop.f32.mrb[9].mxu1 }
 0x405   :  { %v577_v24 = vpop.f32.mrb[10].mxu1 }
 0x406   :  { %2005 = vtanh.f32 %v575_v22  ;;  %v1865_v25 = vpop.f32.mrb[11].mxu1  ;;  %v1715_v29 = vmul.f32 -1.442695, %v575_v22 }
 0x407   :  { %2007 = vpow2.f32 %v1713_v28 }
 0x408   :  { %2009 = vpow2.f32 %v1715_v29 }
 0x40c   :  { %v2004_v26 = vpop.eup %2003 }
 0x40d   :  { %519 = vrot.lane.b32.xlu0 %v2004_v26, %s2373_s20 }
 0x410   :  { %v2006_v27 = vpop.eup %2005 }
 0x411   :  { %589 = vrot.lane.b32.xlu1 %v2006_v27, %s2373_s20  ;;  %v2008_v30 = vpop.eup %2007 }
 0x412   :  { %v513_v31 = vadd.f32 1.0, %v2008_v30  ;;  %v2010_v32 = vpop.eup %2009 }
 0x413   :  { %v583_v33 = vadd.f32 1.0, %v2010_v32 }
 0x414   :  { %2011 = vrcp.f32 %v513_v31 }
 0x415   :  { %2013 = vrcp.f32 %v583_v33 }
 0x41e   :  { %v2012_v34 = vpop.eup %2011 }
 0x41f   :  { %v2014_v37 = vpop.eup %2013  ;;  %v517_v40 = vmul.f32 %v2012_v34, %v2615_v59 }
 0x420   :  { %v587_v43 = vmul.f32 %v2014_v37, %v2618_v62  ;;  %v694_v62 = vld [vmem:[#allocation3 + $0xa] sm:$0x3] }
 0x47f   :  { %v520_v35 = vpop.permute.xlu0 %519 }
 0x480   :  { %v522_v36 = vmul.f32 %v2012_v34, %v520_v35 }
 0x482   :  { %524 = vrot.lane.b32.xlu0 %v522_v36, %s2380_s24 }
 0x483   :  { %v590_v38 = vpop.permute.xlu1 %589 }
 0x484   :  { %v592_v39 = vmul.f32 %v2014_v37, %v590_v38 }
 0x486   :  { %594 = vrot.lane.b32.xlu1 %v592_v39, %s2380_s24 }
 0x4f4   :  { %v525_v41 = vpop.permute.xlu0 %524 }
 0x4f5   :  { %v2650_v42 = vadd.f32 %v525_v41, %v517_v40  ;;  %v782_v41 = vld [vmem:[#allocation2 + $0x6] sm:$0x3] }
 0x4f7   :  { %2015 = vtanh.f32 %v2650_v42 }
 0x4f8   :  { %v595_v44 = vpop.permute.xlu1 %594 }
 0x4f9   :  { %v2654_v45 = vadd.f32 %v595_v44, %v587_v43 }
 0x4fb   :  { %2017 = vtanh.f32 %v2654_v45 }
 0x501   :  { %v2016_v46 = vpop.eup %2015 }
 0x502   :  { %530 = vrot.lane.b32.xlu0 %v2016_v46, %s2373_s20 }
 0x505   :  { %v2018_v47 = vpop.eup %2017 }
 0x506   :  { %600 = vrot.lane.b32.xlu1 %v2018_v47, %s2373_s20  ;;  %v852_v47 = vld [vmem:[#allocation3 + $0x8] sm:$0x3] }
 0x574   :  { %v531_v48 = vpop.permute.xlu0 %530 }
 0x575   :  { %v533_v49 = vmul.f32 %v2012_v34, %v531_v48 }
 0x577   :  { %v2659_v50 = vpack.c.bf16 %v533_v49, %v533_v49 }
 0x578   :  { %v601_v51 = vpop.permute.xlu1 %600 }
 0x579   :  { %v603_v52 = vmul.f32 %v2014_v37, %v601_v51  ;;  %625 = vrot.lane.b32.xlu0 %v2659_v50, %s2380_s24 }
 0x57b   :  { %v2663_v53 = vpack.c.bf16 %v603_v52, %v603_v52 }
 0x57d   :  { %695 = vrot.lane.b32.xlu1 %v2663_v53, %s2380_s24 }
 0x5eb   :  { %v626_v54 = vpop.permute.xlu0 %625 }
 0x5ec   :  { %1871 = vmatmul.mubr.msk.bf16.vlgmr.msra.gmra.mrb[12].mxu0 %vm288_vm3, %v626_v54 }
 0x5ed   :  { %1883 = vmatpush3.bf16.msra.mxu0 %v2562_v5  ;;  %1886 = vmatprep.mubr.msk.bf16.mxu0 %vm2379_vm1, %v2378_v0 }
 0x5ee   :  { %1884 = vmatprep.subr.bf16.mxu0 %v2378_v0 }
 0x5ef   :  { %v696_v55 = vpop.permute.xlu1 %695 }
 0x5f0   :  { %1879 = vmatmul.mubr.msk.bf16.vlgmr.msra.gmra.mrb[12].mxu1 %vm288_vm3, %v696_v55 }
 0x5f1   :  { %1891 = vmatpush3.bf16.msra.mxu1 %v2568_v6  ;;  %1885 = vmatpush3.bf16.msra.mxu0 %v2571_v7 }
 0x5f2   :  { %1892 = vmatprep.subr.bf16.mxu1 %v2378_v0  ;;  %1894 = vmatprep.mubr.msk.bf16.mxu1 %vm2379_vm1, %v2378_v0 }
 0x5f3   :  { %1898 = vmatprep.subr.bf16.mxu0 %v2378_v0 }
 0x5f5   :  { %1893 = vmatpush3.bf16.msra.mxu1 %v2581_v9 }
 0x5f6   :  { %1906 = vmatprep.subr.bf16.mxu1 %v2378_v0 }
 0x6bf   :  { %v664_v57 = vpop.f32.mrb[12].mxu0 }
 0x6c0   :  { %v665_v58 = vadd.f32 %v664_v57, %v624_v56  ;;  %v1872_v59 = vpop.f32.mrb[13].mxu0 }
 0x6c1   :  { %v667_v60 = vpop.f32.mrb[14].mxu0 }
 0x6c2   :  { %2019 = vtanh.f32 %v665_v58  ;;  %v1873_v61 = vpop.f32.mrb[15].mxu0  ;;  %v1719_v13 = vmul.f32 -1.442695, %v665_v58 }
 0x6c3   :  { %v734_v63 = vpop.f32.mrb[12].mxu1 }
 0x6c4   :  { %v735_v1 = vadd.f32 %v734_v63, %v694_v62  ;;  %v1880_v2 = vpop.f32.mrb[13].mxu1 }
 0x6c5   :  { %v737_v3 = vpop.f32.mrb[14].mxu1 }
 0x6c6   :  { %2021 = vtanh.f32 %v735_v1  ;;  %v1881_v8 = vpop.f32.mrb[15].mxu1  ;;  %v1721_v14 = vmul.f32 -1.442695, %v735_v1 }
 0x6c7   :  { %2023 = vpow2.f32 %v1719_v13 }
 0x6c8   :  { %2025 = vpow2.f32 %v1721_v14 }
 0x6cc   :  { %v2020_v10 = vpop.eup %2019 }
 0x6cd   :  { %679 = vrot.lane.b32.xlu0 %v2020_v10, %s2373_s20 }
 0x6d0   :  { %v2022_v12 = vpop.eup %2021 }
 0x6d1   :  { %749 = vrot.lane.b32.xlu1 %v2022_v12, %s2373_s20  ;;  %v2024_v15 = vpop.eup %2023 }
 0x6d2   :  { %v673_v16 = vadd.f32 1.0, %v2024_v15  ;;  %v2026_v17 = vpop.eup %2025 }
 0x6d3   :  { %v743_v18 = vadd.f32 1.0, %v2026_v17 }
 0x6d4   :  { %2027 = vrcp.f32 %v673_v16 }
 0x6d5   :  { %2029 = vrcp.f32 %v743_v18 }
 0x6de   :  { %v2028_v19 = vpop.eup %2027 }
 0x6df   :  { %v2030_v22 = vpop.eup %2029  ;;  %v677_v25 = vmul.f32 %v2028_v19, %v2650_v42 }
 0x6e0   :  { %v747_v28 = vmul.f32 %v2030_v22, %v2654_v45 }
 0x73f   :  { %v680_v20 = vpop.permute.xlu0 %679 }
 0x740   :  { %v682_v21 = vmul.f32 %v2028_v19, %v680_v20 }
 0x742   :  { %684 = vrot.lane.b32.xlu0 %v682_v21, %s2380_s24 }
 0x743   :  { %v750_v23 = vpop.permute.xlu1 %749 }
 0x744   :  { %v752_v24 = vmul.f32 %v2030_v22, %v750_v23 }
 0x746   :  { %754 = vrot.lane.b32.xlu1 %v752_v24, %s2380_s24 }
 0x7b4   :  { %v685_v26 = vpop.permute.xlu0 %684 }
 0x7b5   :  { %v2686_v27 = vadd.f32 %v685_v26, %v677_v25 }
 0x7b7   :  { %2031 = vtanh.f32 %v2686_v27 }
 0x7b8   :  { %v755_v29 = vpop.permute.xlu1 %754 }
 0x7b9   :  { %v2690_v30 = vadd.f32 %v755_v29, %v747_v28  ;;  %v939_v28 = vld [vmem:[#allocation2 + $0x8] sm:$0x3] }
 0x7bb   :  { %2033 = vtanh.f32 %v2690_v30 }
 0x7c1   :  { %v2032_v31 = vpop.eup %2031 }
 0x7c2   :  { %690 = vrot.lane.b32.xlu0 %v2032_v31, %s2373_s20 }
 0x7c5   :  { %v2034_v32 = vpop.eup %2033 }
 0x7c6   :  { %760 = vrot.lane.b32.xlu1 %v2034_v32, %s2373_s20 }
 0x834   :  { %v691_v33 = vpop.permute.xlu0 %690 }
 0x835   :  { %v693_v34 = vmul.f32 %v2028_v19, %v691_v33 }
 0x837   :  { %v2695_v35 = vpack.c.bf16 %v693_v34, %v693_v34  ;;  %v1009_v34 = vld [vmem:[#allocation3 + $0x6] sm:$0x3] }
 0x838   :  { %v761_v36 = vpop.permute.xlu1 %760 }
 0x839   :  { %v763_v37 = vmul.f32 %v2030_v22, %v761_v36  ;;  %783 = vrot.lane.b32.xlu0 %v2695_v35, %s2380_s24 }
 0x83b   :  { %v2699_v38 = vpack.c.bf16 %v763_v37, %v763_v37 }
 0x83d   :  { %853 = vrot.lane.b32.xlu1 %v2699_v38, %s2380_s24 }
 0x8ab   :  { %v784_v39 = vpop.permute.xlu0 %783 }
 0x8ac   :  { %1887 = vmatmul.mubr.msk.bf16.vlgmr.msra.gmra.mrb[16].mxu0 %vm288_vm3, %v784_v39 }
 0x8ad   :  { %1899 = vmatpush3.bf16.msra.mxu0 %v2562_v5  ;;  %1902 = vmatprep.mubr.msk.bf16.mxu0 %vm2379_vm1, %v2378_v0 }
 0x8ae   :  { %1900 = vmatprep.subr.bf16.mxu0 %v2378_v0 }
 0x8af   :  { %v854_v40 = vpop.permute.xlu1 %853 }
 0x8b0   :  { %1895 = vmatmul.mubr.msk.bf16.vlgmr.msra.gmra.mrb[16].mxu1 %vm288_vm3, %v854_v40 }
 0x8b1   :  { %1907 = vmatpush3.bf16.msra.mxu1 %v2568_v6  ;;  %1901 = vmatpush3.bf16.msra.mxu0 %v2571_v7 }
 0x8b2   :  { %1908 = vmatprep.subr.bf16.mxu1 %v2378_v0  ;;  %1910 = vmatprep.mubr.msk.bf16.mxu1 %vm2379_vm1, %v2378_v0 }
 0x8b3   :  { %1914 = vmatprep.subr.bf16.mxu0 %v2378_v0 }
 0x8b5   :  { %1909 = vmatpush3.bf16.msra.mxu1 %v2581_v9 }
 0x8b6   :  { %1922 = vmatprep.subr.bf16.mxu1 %v2378_v0 }
 0x97f   :  { %v822_v42 = vpop.f32.mrb[16].mxu0 }
 0x980   :  { %v823_v43 = vadd.f32 %v822_v42, %v782_v41  ;;  %v1888_v44 = vpop.f32.mrb[17].mxu0 }
 0x981   :  { %v825_v45 = vpop.f32.mrb[18].mxu0 }
 0x982   :  { %2035 = vtanh.f32 %v823_v43  ;;  %v1889_v46 = vpop.f32.mrb[19].mxu0  ;;  %v1725_v57 = vmul.f32 -1.442695, %v823_v43 }
 0x983   :  { %v892_v48 = vpop.f32.mrb[16].mxu1 }
 0x984   :  { %v893_v49 = vadd.f32 %v892_v48, %v852_v47  ;;  %v1896_v51 = vpop.f32.mrb[17].mxu1 }
 0x985   :  { %v895_v52 = vpop.f32.mrb[18].mxu1 }
 0x986   :  { %2037 = vtanh.f32 %v893_v49  ;;  %v1897_v54 = vpop.f32.mrb[19].mxu1  ;;  %v1727_v58 = vmul.f32 -1.442695, %v893_v49 }
 0x987   :  { %2039 = vpow2.f32 %v1725_v57 }
 0x988   :  { %2041 = vpow2.f32 %v1727_v58 }
 0x98c   :  { %v2036_v55 = vpop.eup %2035 }
 0x98d   :  { %837 = vrot.lane.b32.xlu0 %v2036_v55, %s2373_s20 }
 0x990   :  { %v2038_v56 = vpop.eup %2037 }
 0x991   :  { %907 = vrot.lane.b32.xlu1 %v2038_v56, %s2373_s20  ;;  %v2040_v59 = vpop.eup %2039 }
 0x992   :  { %v831_v60 = vadd.f32 1.0, %v2040_v59  ;;  %v2042_v61 = vpop.eup %2041 }
 0x993   :  { %v901_v62 = vadd.f32 1.0, %v2042_v61 }
 0x994   :  { %2043 = vrcp.f32 %v831_v60 }
 0x995   :  { %2045 = vrcp.f32 %v901_v62 }
 0x99e   :  { %v2044_v63 = vpop.eup %2043 }
 0x99f   :  { %v2046_v3 = vpop.eup %2045  ;;  %v835_v12 = vmul.f32 %v2044_v63, %v2686_v27 }
 0x9a0   :  { %v905_v15 = vmul.f32 %v2046_v3, %v2690_v30 }
 0x9ff   :  { %v838_v1 = vpop.permute.xlu0 %837 }
 0xa00   :  { %v840_v2 = vmul.f32 %v2044_v63, %v838_v1 }
 0xa02   :  { %842 = vrot.lane.b32.xlu0 %v840_v2, %s2380_s24 }
 0xa03   :  { %v908_v8 = vpop.permute.xlu1 %907 }
 0xa04   :  { %v910_v10 = vmul.f32 %v2046_v3, %v908_v8 }
 0xa06   :  { %912 = vrot.lane.b32.xlu1 %v910_v10, %s2380_s24 }
 0xa74   :  { %v843_v13 = vpop.permute.xlu0 %842 }
 0xa75   :  { %v2722_v14 = vadd.f32 %v843_v13, %v835_v12 }
 0xa77   :  { %2047 = vtanh.f32 %v2722_v14 }
 0xa78   :  { %v913_v16 = vpop.permute.xlu1 %912 }
 0xa79   :  { %v2726_v17 = vadd.f32 %v913_v16, %v905_v15 }
 0xa7b   :  { %2049 = vtanh.f32 %v2726_v17 }
 0xa81   :  { %v2048_v18 = vpop.eup %2047 }
 0xa82   :  { %848 = vrot.lane.b32.xlu0 %v2048_v18, %s2373_s20 }
 0xa85   :  { %v2050_v19 = vpop.eup %2049 }
 0xa86   :  { %918 = vrot.lane.b32.xlu1 %v2050_v19, %s2373_s20 }
 0xaf4   :  { %v849_v20 = vpop.permute.xlu0 %848 }
 0xaf5   :  { %v851_v21 = vmul.f32 %v2044_v63, %v849_v20 }
 0xaf7   :  { %v2731_v22 = vpack.c.bf16 %v851_v21, %v851_v21 }
 0xaf8   :  { %v919_v23 = vpop.permute.xlu1 %918 }
 0xaf9   :  { %v921_v24 = vmul.f32 %v2046_v3, %v919_v23  ;;  %940 = vrot.lane.b32.xlu0 %v2731_v22, %s2380_s24 }
 0xafb   :  { %v2735_v25 = vpack.c.bf16 %v921_v24, %v921_v24  ;;  %v1166_v24 = vld [vmem:[#allocation3 + $0x4] sm:$0x3] }
 0xafd   :  { %1010 = vrot.lane.b32.xlu1 %v2735_v25, %s2380_s24 }
 0xb6b   :  { %v941_v26 = vpop.permute.xlu0 %940 }
 0xb6c   :  { %1903 = vmatmul.mubr.msk.bf16.vlgmr.msra.gmra.mrb[20].mxu0 %vm288_vm3, %v941_v26 }
 0xb6d   :  { %1915 = vmatpush3.bf16.msra.mxu0 %v2562_v5  ;;  %1918 = vmatprep.mubr.msk.bf16.mxu0 %vm2379_vm1, %v2378_v0 }
 0xb6e   :  { %1916 = vmatprep.subr.bf16.mxu0 %v2378_v0 }
 0xb6f   :  { %v1011_v27 = vpop.permute.xlu1 %1010 }
 0xb70   :  { %1911 = vmatmul.mubr.msk.bf16.vlgmr.msra.gmra.mrb[20].mxu1 %vm288_vm3, %v1011_v27 }
 0xb71   :  { %1923 = vmatpush3.bf16.msra.mxu1 %v2568_v6  ;;  %1917 = vmatpush3.bf16.msra.mxu0 %v2571_v7 }
 0xb72   :  { %1924 = vmatprep.subr.bf16.mxu1 %v2378_v0  ;;  %1926 = vmatprep.mubr.msk.bf16.mxu1 %vm2379_vm1, %v2378_v0 }
 0xb73   :  { %1930 = vmatprep.subr.bf16.mxu0 %v2378_v0 }
 0xb75   :  { %1925 = vmatpush3.bf16.msra.mxu1 %v2581_v9 }
 0xb76   :  { %1938 = vmatprep.subr.bf16.mxu1 %v2378_v0 }
 0xc3f   :  { %v979_v29 = vpop.f32.mrb[20].mxu0 }
 0xc40   :  { %v980_v30 = vadd.f32 %v979_v29, %v939_v28  ;;  %v1904_v31 = vpop.f32.mrb[21].mxu0 }
 0xc41   :  { %v982_v32 = vpop.f32.mrb[22].mxu0 }
 0xc42   :  { %2051 = vtanh.f32 %v980_v30  ;;  %v1905_v33 = vpop.f32.mrb[23].mxu0  ;;  %v1731_v44 = vmul.f32 -1.442695, %v980_v30 }
 0xc43   :  { %v1049_v36 = vpop.f32.mrb[20].mxu1 }
 0xc44   :  { %v1050_v37 = vadd.f32 %v1049_v36, %v1009_v34  ;;  %v1912_v39 = vpop.f32.mrb[21].mxu1 }
 0xc45   :  { %v1052_v40 = vpop.f32.mrb[22].mxu1 }
 0xc46   :  { %2053 = vtanh.f32 %v1050_v37  ;;  %v1913_v41 = vpop.f32.mrb[23].mxu1  ;;  %v1733_v45 = vmul.f32 -1.442695, %v1050_v37 }
 0xc47   :  { %2055 = vpow2.f32 %v1731_v44 }
 0xc48   :  { %2057 = vpow2.f32 %v1733_v45 }
 0xc4c   :  { %v2052_v42 = vpop.eup %2051 }
 0xc4d   :  { %994 = vrot.lane.b32.xlu0 %v2052_v42, %s2373_s20 }
 0xc50   :  { %v2054_v43 = vpop.eup %2053 }
 0xc51   :  { %1064 = vrot.lane.b32.xlu1 %v2054_v43, %s2373_s20  ;;  %v2056_v46 = vpop.eup %2055 }
 0xc52   :  { %v988_v47 = vadd.f32 1.0, %v2056_v46  ;;  %v2058_v48 = vpop.eup %2057 }
 0xc53   :  { %v1058_v49 = vadd.f32 1.0, %v2058_v48 }
 0xc54   :  { %2059 = vrcp.f32 %v988_v47 }
 0xc55   :  { %2061 = vrcp.f32 %v1058_v49 }
 0xc5e   :  { %v2060_v51 = vpop.eup %2059 }
 0xc5f   :  { %v2062_v55 = vpop.eup %2061  ;;  %v992_v58 = vmul.f32 %v2060_v51, %v2722_v14 }
 0xc60   :  { %v1062_v61 = vmul.f32 %v2062_v55, %v2726_v17  ;;  %v1096_v17 = vld [vmem:[#allocation2 + $0xa] sm:$0x3] }
 0xcbf   :  { %v995_v52 = vpop.permute.xlu0 %994 }
 0xcc0   :  { %v997_v54 = vmul.f32 %v2060_v51, %v995_v52 }
 0xcc2   :  { %999 = vrot.lane.b32.xlu0 %v997_v54, %s2380_s24 }
 0xcc3   :  { %v1065_v56 = vpop.permute.xlu1 %1064 }
 0xcc4   :  { %v1067_v57 = vmul.f32 %v2062_v55, %v1065_v56 }
 0xcc6   :  { %1069 = vrot.lane.b32.xlu1 %v1067_v57, %s2380_s24 }
 0xd34   :  { %v1000_v59 = vpop.permute.xlu0 %999 }
 0xd35   :  { %v2758_v60 = vadd.f32 %v1000_v59, %v992_v58 }
 0xd37   :  { %2063 = vtanh.f32 %v2758_v60 }
 0xd38   :  { %v1070_v62 = vpop.permute.xlu1 %1069 }
 0xd39   :  { %v2762_v63 = vadd.f32 %v1070_v62, %v1062_v61 }
 0xd3b   :  { %2065 = vtanh.f32 %v2762_v63 }
 0xd41   :  { %v2064_v1 = vpop.eup %2063 }
 0xd42   :  { %1005 = vrot.lane.b32.xlu0 %v2064_v1, %s2373_s20 }
 0xd45   :  { %v2066_v2 = vpop.eup %2065 }
 0xd46   :  { %1075 = vrot.lane.b32.xlu1 %v2066_v2, %s2373_s20 }
 0xdb4   :  { %v1006_v3 = vpop.permute.xlu0 %1005 }
 0xdb5   :  { %v1008_v8 = vmul.f32 %v2060_v51, %v1006_v3 }
 0xdb7   :  { %v2767_v10 = vpack.c.bf16 %v1008_v8, %v1008_v8 }
 0xdb8   :  { %v1076_v12 = vpop.permute.xlu1 %1075 }
 0xdb9   :  { %v1078_v13 = vmul.f32 %v2062_v55, %v1076_v12  ;;  %1097 = vrot.lane.b32.xlu0 %v2767_v10, %s2380_s24 }
 0xdbb   :  { %v2771_v14 = vpack.c.bf16 %v1078_v13, %v1078_v13 }
 0xdbd   :  { %1167 = vrot.lane.b32.xlu1 %v2771_v14, %s2380_s24 }
 0xe2b   :  { %v1098_v15 = vpop.permute.xlu0 %1097 }
 0xe2c   :  { %1919 = vmatmul.mubr.msk.bf16.vlgmr.msra.gmra.mrb[24].mxu0 %vm288_vm3, %v1098_v15  ;;  %v1324_v15 = vld [vmem:[#allocation3 + $0x2] sm:$0x3] }
 0xe2d   :  { %1931 = vmatpush3.bf16.msra.mxu0 %v2562_v5  ;;  %1934 = vmatprep.mubr.msk.bf16.mxu0 %vm2379_vm1, %v2378_v0 }
 0xe2e   :  { %1932 = vmatprep.subr.bf16.mxu0 %v2378_v0 }
 0xe2f   :  { %v1168_v16 = vpop.permute.xlu1 %1167 }
 0xe30   :  { %1927 = vmatmul.mubr.msk.bf16.vlgmr.msra.gmra.mrb[24].mxu1 %vm288_vm3, %v1168_v16 }
 0xe31   :  { %1939 = vmatpush3.bf16.msra.mxu1 %v2568_v6  ;;  %1933 = vmatpush3.bf16.msra.mxu0 %v2571_v7 }
 0xe32   :  { %1940 = vmatprep.subr.bf16.mxu1 %v2378_v0  ;;  %1942 = vmatprep.mubr.msk.bf16.mxu1 %vm2379_vm1, %v2378_v0 }
 0xe33   :  { %1946 = vmatprep.subr.bf16.mxu0 %v2378_v0 }
 0xe35   :  { %1941 = vmatpush3.bf16.msra.mxu1 %v2581_v9 }
 0xe36   :  { %1954 = vmatprep.subr.bf16.mxu1 %v2378_v0 }
 0xeff   :  { %v1136_v18 = vpop.f32.mrb[24].mxu0 }
 0xf00   :  { %v1137_v19 = vadd.f32 %v1136_v18, %v1096_v17  ;;  %v1920_v20 = vpop.f32.mrb[25].mxu0 }
 0xf01   :  { %v1139_v21 = vpop.f32.mrb[26].mxu0 }
 0xf02   :  { %2067 = vtanh.f32 %v1137_v19  ;;  %v1921_v23 = vpop.f32.mrb[27].mxu0  ;;  %v1737_v33 = vmul.f32 -1.442695, %v1137_v19 }
 0xf03   :  { %v1206_v26 = vpop.f32.mrb[24].mxu1 }
 0xf04   :  { %v1207_v27 = vadd.f32 %v1206_v26, %v1166_v24  ;;  %v1928_v28 = vpop.f32.mrb[25].mxu1 }
 0xf05   :  { %v1209_v29 = vpop.f32.mrb[26].mxu1 }
 0xf06   :  { %2069 = vtanh.f32 %v1207_v27  ;;  %v1929_v30 = vpop.f32.mrb[27].mxu1  ;;  %v1739_v34 = vmul.f32 -1.442695, %v1207_v27 }
 0xf07   :  { %2071 = vpow2.f32 %v1737_v33 }
 0xf08   :  { %2073 = vpow2.f32 %v1739_v34 }
 0xf0c   :  { %v2068_v31 = vpop.eup %2067 }
 0xf0d   :  { %1151 = vrot.lane.b32.xlu0 %v2068_v31, %s2373_s20 }
 0xf10   :  { %v2070_v32 = vpop.eup %2069 }
 0xf11   :  { %1221 = vrot.lane.b32.xlu1 %v2070_v32, %s2373_s20  ;;  %v2072_v36 = vpop.eup %2071 }
 0xf12   :  { %v1145_v37 = vadd.f32 1.0, %v2072_v36  ;;  %v2074_v39 = vpop.eup %2073 }
 0xf13   :  { %v1215_v40 = vadd.f32 1.0, %v2074_v39 }
 0xf14   :  { %2075 = vrcp.f32 %v1145_v37 }
 0xf15   :  { %2077 = vrcp.f32 %v1215_v40 }
 0xf1e   :  { %v2076_v41 = vpop.eup %2075 }
 0xf1f   :  { %v2078_v44 = vpop.eup %2077  ;;  %v1149_v47 = vmul.f32 %v2076_v41, %v2758_v60 }
 0xf20   :  { %v1219_v51 = vmul.f32 %v2078_v44, %v2762_v63 }
 0xf7f   :  { %v1152_v42 = vpop.permute.xlu0 %1151 }
 0xf80   :  { %v1154_v43 = vmul.f32 %v2076_v41, %v1152_v42 }
 0xf82   :  { %1156 = vrot.lane.b32.xlu0 %v1154_v43, %s2380_s24 }
 0xf83   :  { %v1222_v45 = vpop.permute.xlu1 %1221 }
 0xf84   :  { %v1224_v46 = vmul.f32 %v2078_v44, %v1222_v45 }
 0xf86   :  { %1226 = vrot.lane.b32.xlu1 %v1224_v46, %s2380_s24 }
 0xff4   :  { %v1157_v48 = vpop.permute.xlu0 %1156 }
 0xff5   :  { %v2794_v49 = vadd.f32 %v1157_v48, %v1149_v47 }
 0xff7   :  { %2079 = vtanh.f32 %v2794_v49 }
 0xff8   :  { %v1227_v52 = vpop.permute.xlu1 %1226 }
 0xff9   :  { %v2798_v54 = vadd.f32 %v1227_v52, %v1219_v51  ;;  %v1412_v52 = vld [vmem:[#allocation2 + $0xe] sm:$0x3] }
 0xffb   :  { %2081 = vtanh.f32 %v2798_v54 }
0x1001   :  { %v2080_v55 = vpop.eup %2079 }
0x1002   :  { %1162 = vrot.lane.b32.xlu0 %v2080_v55, %s2373_s20 }
0x1005   :  { %v2082_v56 = vpop.eup %2081 }
0x1006   :  { %1232 = vrot.lane.b32.xlu1 %v2082_v56, %s2373_s20 }
0x1074   :  { %v1163_v57 = vpop.permute.xlu0 %1162 }
0x1075   :  { %v1165_v58 = vmul.f32 %v2076_v41, %v1163_v57 }
0x1077   :  { %v2803_v59 = vpack.c.bf16 %v1165_v58, %v1165_v58 }
0x1078   :  { %v1233_v60 = vpop.permute.xlu1 %1232 }
0x1079   :  { %v1235_v61 = vmul.f32 %v2078_v44, %v1233_v60  ;;  %1255 = vrot.lane.b32.xlu0 %v2803_v59, %s2380_s24  ;;  %v1482_v60 = vld [vmem:[#allocation3] sm:$0x3] }
0x107b   :  { %v2807_v62 = vpack.c.bf16 %v1235_v61, %v1235_v61 }
0x107d   :  { %1325 = vrot.lane.b32.xlu1 %v2807_v62, %s2380_s24 }
0x10eb   :  { %v1256_v63 = vpop.permute.xlu0 %1255 }
0x10ec   :  { %1935 = vmatmul.mubr.msk.bf16.vlgmr.msra.gmra.mrb[28].mxu0 %vm288_vm3, %v1256_v63 }
0x10ed   :  { %1947 = vmatpush3.bf16.msra.mxu0 %v2562_v5  ;;  %1950 = vmatprep.mubr.msk.bf16.mxu0 %vm2379_vm1, %v2378_v0  ;;  %v1254_v5 = vld [vmem:[#allocation2 + $0xc] sm:$0x3] }
0x10ee   :  { %1948 = vmatprep.subr.bf16.mxu0 %v2378_v0 }
0x10ef   :  { %v1326_v1 = vpop.permute.xlu1 %1325 }
0x10f0   :  { %1943 = vmatmul.mubr.msk.bf16.vlgmr.msra.gmra.mrb[28].mxu1 %vm288_vm3, %v1326_v1 }
0x10f1   :  { %1955 = vmatpush3.bf16.msra.mxu1 %v2568_v6  ;;  %1949 = vmatpush3.bf16.msra.mxu0 %v2571_v7 }
0x10f2   :  { %1956 = vmatprep.subr.bf16.mxu1 %v2378_v0  ;;  %1958 = vmatprep.mubr.msk.bf16.mxu1 %vm2379_vm1, %v2378_v0 }
0x10f5   :  { %1957 = vmatpush3.bf16.msra.mxu1 %v2581_v9 }
0x11bf   :  { %v1294_v2 = vpop.f32.mrb[28].mxu0 }
0x11c0   :  { %v1295_v3 = vadd.f32 %v1294_v2, %v1254_v5  ;;  %v1936_v8 = vpop.f32.mrb[29].mxu0 }
0x11c1   :  { %v1297_v12 = vpop.f32.mrb[30].mxu0 }
0x11c2   :  { %2083 = vtanh.f32 %v1295_v3  ;;  %v1937_v13 = vpop.f32.mrb[31].mxu0  ;;  %v1743_v9 = vmul.f32 -1.442695, %v1295_v3 }
0x11c3   :  { %v1364_v16 = vpop.f32.mrb[28].mxu1 }
0x11c4   :  { %v1365_v17 = vadd.f32 %v1364_v16, %v1324_v15  ;;  %v1944_v6 = vpop.f32.mrb[29].mxu1 }
0x11c5   :  { %v1367_v18 = vpop.f32.mrb[30].mxu1 }
0x11c6   :  { %2085 = vtanh.f32 %v1365_v17  ;;  %v1945_v7 = vpop.f32.mrb[31].mxu1  ;;  %v1745_v20 = vmul.f32 -1.442695, %v1365_v17 }
0x11c7   :  { %2087 = vpow2.f32 %v1743_v9 }
0x11c8   :  { %2089 = vpow2.f32 %v1745_v20 }
0x11cc   :  { %v2084_v19 = vpop.eup %2083 }
0x11cd   :  { %1309 = vrot.lane.b32.xlu0 %v2084_v19, %s2373_s20 }
0x11d0   :  { %v2086_v0 = vpop.eup %2085 }
0x11d1   :  { %1379 = vrot.lane.b32.xlu1 %v2086_v0, %s2373_s20  ;;  %v2088_v21 = vpop.eup %2087 }
0x11d2   :  { %v1303_v23 = vadd.f32 1.0, %v2088_v21  ;;  %v2090_v24 = vpop.eup %2089 }
0x11d3   :  { %v1373_v26 = vadd.f32 1.0, %v2090_v24 }
0x11d4   :  { %2091 = vrcp.f32 %v1303_v23 }
0x11d5   :  { %2093 = vrcp.f32 %v1373_v26 }
0x11de   :  { %v2092_v27 = vpop.eup %2091 }
0x11df   :  { %v2094_v30 = vpop.eup %2093  ;;  %v1307_v33 = vmul.f32 %v2092_v27, %v2794_v49 }
0x11e0   :  { %v1377_v37 = vmul.f32 %v2094_v30, %v2798_v54 }
0x123f   :  { %v1310_v28 = vpop.permute.xlu0 %1309 }
0x1240   :  { %v1312_v29 = vmul.f32 %v2092_v27, %v1310_v28 }
0x1242   :  { %1314 = vrot.lane.b32.xlu0 %v1312_v29, %s2380_s24 }
0x1243   :  { %v1380_v31 = vpop.permute.xlu1 %1379 }
0x1244   :  { %v1382_v32 = vmul.f32 %v2094_v30, %v1380_v31 }
0x1246   :  { %1384 = vrot.lane.b32.xlu1 %v1382_v32, %s2380_s24  ;;  %v618_v32 = vrot.slane %v2663_v53, 6  ;;  %v608_v53 = vrot.slane %v2659_v50, 7 }
0x12b4   :  { %v1315_v34 = vpop.permute.xlu0 %1314 }
0x12b5   :  { %v1317_v36 = vadd.f32 %v1315_v34, %v1307_v33  ;;  %v777_v33 = vrot.slane %v2699_v38, 7  ;;  %v1091_v34 = vrot.slane %v2771_v14, 5  ;;  %v768_v38 = vrot.slane %v2695_v35, 6 }
0x12b6   :  { %v1240_v14 = vrot.slane %v2803_v59, 7 }
0x12b7   :  { %2095 = vtanh.f32 %v1317_v36 }
0x12b8   :  { %v1385_v39 = vpop.permute.xlu1 %1384 }
0x12b9   :  { %v1387_v40 = vadd.f32 %v1385_v39, %v1377_v37 }
0x12bb   :  { %2097 = vtanh.f32 %v1387_v40 }
0x12c1   :  { %v2096_v41 = vpop.eup %2095 }
0x12c2   :  { %1320 = vrot.lane.b32.xlu0 %v2096_v41, %s2373_s20 }
0x12c5   :  { %v2098_v42 = vpop.eup %2097 }
0x12c6   :  { %1390 = vrot.lane.b32.xlu1 %v2098_v42, %s2373_s20 }
0x1334   :  { %v1321_v43 = vpop.permute.xlu0 %1320 }
0x1335   :  { %v1323_v44 = vmul.f32 %v2092_v27, %v1321_v43 }
0x1337   :  { %v2831_v45 = vpack.c.bf16 %v1323_v44, %v1323_v44 }
0x1338   :  { %v1391_v46 = vpop.permute.xlu1 %1390 }
0x1339   :  { %v1393_v47 = vmul.f32 %v2094_v30, %v1391_v46  ;;  %1413 = vrot.lane.b32.xlu0 %v2831_v45, %s2380_s24  ;;  %v458_v30 = vrot.slane %v2627_v11, 5  ;;  %v1249_v11 = vrot.slane %v2807_v62, 6  ;;  %v1398_v50 = vrot.slane %v2831_v45, 6 }
0x133b   :  { %v2835_v48 = vpack.c.bf16 %v1393_v47, %v1393_v47 }
0x133d   :  { %1483 = vrot.lane.b32.xlu1 %v2835_v48, %s2380_s24 }
0x13ab   :  { %v1414_v49 = vpop.permute.xlu0 %1413 }
0x13ac   :  { %1951 = vmatmul.mubr.msk.bf16.vlgmr.msra.gmra.mrb[32].mxu0 %vm288_vm3, %v1414_v49 }
0x13af   :  { %v1484_v51 = vpop.permute.xlu1 %1483 }
0x13b0   :  { %1959 = vmatmul.mubr.msk.bf16.vlgmr.msra.gmra.mrb[32].mxu1 %vm288_vm3, %v1484_v51 }
0x147f   :  { %v1452_v54 = vpop.f32.mrb[32].mxu0 }
0x1480   :  { %v1453_v55 = vadd.f32 %v1452_v54, %v1412_v52  ;;  %v1952_v56 = vpop.f32.mrb[33].mxu0 }
0x1481   :  { %v1455_v57 = vpop.f32.mrb[34].mxu0 }
0x1482   :  { %2099 = vtanh.f32 %v1453_v55  ;;  %v1953_v58 = vpop.f32.mrb[35].mxu0  ;;  %v1749_v12 = vmul.f32 -1.442695, %v1453_v55 }
0x1483   :  { %v1522_v61 = vpop.f32.mrb[32].mxu1 }
0x1484   :  { %v1523_v63 = vadd.f32 %v1522_v61, %v1482_v60  ;;  %v1960_v1 = vpop.f32.mrb[33].mxu1 }
0x1485   :  { %v1525_v5 = vpop.f32.mrb[34].mxu1 }
0x1486   :  { %2101 = vtanh.f32 %v1523_v63  ;;  %v1961_v2 = vpop.f32.mrb[35].mxu1  ;;  %v1751_v13 = vmul.f32 -1.442695, %v1523_v63 }
0x1487   :  { %2103 = vpow2.f32 %v1749_v12 }
0x1488   :  { %2105 = vpow2.f32 %v1751_v13 }
0x148c   :  { %v2100_v3 = vpop.eup %2099 }
0x148d   :  { %1467 = vrot.lane.b32.xlu0 %v2100_v3, %s2373_s20 }
0x1490   :  { %v2102_v8 = vpop.eup %2101 }
0x1491   :  { %1537 = vrot.lane.b32.xlu1 %v2102_v8, %s2373_s20  ;;  %v2104_v15 = vpop.eup %2103 }
0x1492   :  { %v1461_v16 = vadd.f32 1.0, %v2104_v15  ;;  %v2106_v17 = vpop.eup %2105 }
0x1493   :  { %v1531_v6 = vadd.f32 1.0, %v2106_v17 }
0x1494   :  { %2107 = vrcp.f32 %v1461_v16 }
0x1495   :  { %2109 = vrcp.f32 %v1531_v6 }
0x149e   :  { %v2108_v18 = vpop.eup %2107 }
0x149f   :  { %v2110_v0 = vpop.eup %2109  ;;  %v1465_v21 = vmul.f32 %v2108_v18, %v1317_v36  ;;  %v1407_v36 = vrot.slane %v2835_v48, 7 }
0x14a0   :  { %v1535_v26 = vmul.f32 %v2110_v0, %v1387_v40 }
0x14ff   :  { %v1468_v7 = vpop.permute.xlu0 %1467 }
0x1500   :  { %v1470_v19 = vmul.f32 %v2108_v18, %v1468_v7 }
0x1502   :  { %1472 = vrot.lane.b32.xlu0 %v1470_v19, %s2380_s24 }
0x1503   :  { %v1538_v9 = vpop.permute.xlu1 %1537 }
0x1504   :  { %v1540_v20 = vmul.f32 %v2110_v0, %v1538_v9 }
0x1506   :  { %1542 = vrot.lane.b32.xlu1 %v1540_v20, %s2380_s24 }
0x1574   :  { %v1473_v23 = vpop.permute.xlu0 %1472 }
0x1575   :  { %v1475_v24 = vadd.f32 %v1473_v23, %v1465_v21 }
0x1577   :  { %2111 = vtanh.f32 %v1475_v24 }
0x1578   :  { %v1543_v27 = vpop.permute.xlu1 %1542 }
0x1579   :  { %v1545_v28 = vadd.f32 %v1543_v27, %v1535_v26 }
0x157b   :  { %2113 = vtanh.f32 %v1545_v28 }
0x1581   :  { %v2112_v29 = vpop.eup %2111 }
0x1582   :  { %1478 = vrot.lane.b32.xlu0 %v2112_v29, %s2373_s20 }
0x1585   :  { %v2114_v31 = vpop.eup %2113 }
0x1586   :  { %1548 = vrot.lane.b32.xlu1 %v2114_v31, %s2373_s20  ;;  %459 = vrot.lane.b32.xlu0 %v458_v30, %s2380_s24 }
0x158a   :  { %619 = vrot.lane.b32.xlu1 %v618_v32, %s2380_s24  ;;  %778 = vrot.lane.b32.xlu0 %v777_v33, %s2380_s24 }
0x158e   :  { %935 = vrot.lane.b32.xlu1 %v2735_v25, %s2380_s24  ;;  %1092 = vrot.lane.b32.xlu0 %v1091_v34, %s2380_s24  ;;  %v926_v25 = vrot.slane %v2731_v22, 5 }
0x1592   :  { %1250 = vrot.lane.b32.xlu1 %v1249_v11, %s2380_s24  ;;  %1408 = vrot.lane.b32.xlu0 %v1407_v36, %s2380_s24 }
0x1596   :  { %449 = vrot.lane.b32.xlu1 %v2623_v4, %s2380_s24  ;;  %609 = vrot.lane.b32.xlu0 %v608_v53, %s2380_s24 }
0x159a   :  { %769 = vrot.lane.b32.xlu1 %v768_v38, %s2380_s24  ;;  %927 = vrot.lane.b32.xlu0 %v926_v25, %s2380_s24 }
0x159e   :  { %1083 = vrot.lane.b32.xlu1 %v2767_v10, %s2380_s24  ;;  %1241 = vrot.lane.b32.xlu0 %v1240_v14, %s2380_s24 }
0x15a2   :  { %1399 = vrot.lane.b32.xlu1 %v1398_v50, %s2380_s24 }
0x15f4   :  { %v1479_v4 = vpop.permute.xlu0 %1478 }
0x15f5   :  { %v1481_v62 = vmul.f32 %v2108_v18, %v1479_v4 }
0x15f7   :  { %1570 = vrot.lane.b32.xlu1 %v1481_v62, %s2380_s24  ;;  %v1768_v37 = vpack.c.bf16 %v1481_v62, %v1481_v62 }
0x15f8   :  { %v1549_v35 = vpop.permute.xlu1 %1548  ;;  %v460_v22 = vpop.permute.xlu0 %459 }
0x15f9   :  { %v1551_v39 = vmul.f32 %v2110_v0, %v1549_v35  ;;  %463 = vst.msk [vmem:[#allocation18 + $0x4] sm:$0x8] %vm462_vm4, %v460_v22  ;;  %v1556_v41 = vrot.slane %v1768_v37, 5 }
0x15fb   :  { %v1769_v10 = vpack.c.bf16 %v1551_v39, %v1551_v39  ;;  %1581 = vrot.lane.b32.xlu0 %v1551_v39, %s2380_s24 }
0x15fc   :  { %v620_v59 = vpop.permute.xlu1 %619  ;;  %v779_v40 = vpop.permute.xlu0 %778 }
0x15fd   :  { %623 = vst.msk [vmem:[#allocation18 + $0x4] sm:$0x4] %vm622_vm5, %v620_v59  ;;  %1565 = vrot.lane.b32.xlu1 %v1769_v10, %s2380_s24 }
0x15fe   :  { %781 = vst.msk [vmem:[#allocation18 + $0x4] sm:$0x2] %vm612_vm6, %v779_v40 }
0x15ff   :  { %1557 = vrot.lane.b32.xlu0 %v1556_v41, %s2380_s24 }
0x1600   :  { %v936_v42 = vpop.permute.xlu1 %935  ;;  %v1093_v43 = vpop.permute.xlu0 %1092 }
0x1601   :  { %938 = vst.msk [vmem:[#allocation18 + $0x4] sm:$0x1] %vm452_vm7, %v936_v42  ;;  %1586 = vrot.lane.b32.xlu1 %v1545_v28, %s2381_s6 }
0x1602   :  { %1095 = vst.msk [vmem:[#allocation18] sm:$0x8] %vm462_vm4, %v1093_v43 }
0x1603   :  { %1576 = vrot.lane.b32.xlu0 %v1475_v24, %s2381_s6 }
0x1604   :  { %v1251_v44 = vpop.permute.xlu1 %1250  ;;  %v1409_v45 = vpop.permute.xlu0 %1408 }
0x1605   :  { %1253 = vst.msk [vmem:[#allocation18] sm:$0x4] %vm622_vm5, %v1251_v44 }
0x1606   :  { %1411 = vst.msk [vmem:[#allocation18] sm:$0x2] %vm612_vm6, %v1409_v45 }
0x1608   :  { %v450_v46 = vpop.permute.xlu1 %449  ;;  %v610_v47 = vpop.permute.xlu0 %609 }
0x1609   :  { %453 = vst.msk [vmem:[#allocation17] sm:$0x1] %vm452_vm7, %v450_v46 }
0x160a   :  { %613 = vst.msk [vmem:[#allocation17] sm:$0x2] %vm612_vm6, %v610_v47 }
0x160c   :  { %v770_v48 = vpop.permute.xlu1 %769  ;;  %v928_v49 = vpop.permute.xlu0 %927 }
0x160d   :  { %772 = vst.msk [vmem:[#allocation17] sm:$0x4] %vm622_vm5, %v770_v48 }
0x160e   :  { %930 = vst.msk [vmem:[#allocation17] sm:$0x8] %vm462_vm4, %v928_v49 }
0x1610   :  { %v1084_v51 = vpop.permute.xlu1 %1083  ;;  %v1242_v52 = vpop.permute.xlu0 %1241 }
0x1611   :  { %1086 = vst.msk [vmem:[#allocation17 + $0x4] sm:$0x1] %vm452_vm7, %v1084_v51 }
0x1612   :  { %1244 = vst.msk [vmem:[#allocation17 + $0x4] sm:$0x2] %vm612_vm6, %v1242_v52 }
0x1614   :  { %v1400_v54 = vpop.permute.xlu1 %1399 }
0x1615   :  { %1402 = vst.msk [vmem:[#allocation17 + $0x4] sm:$0x4] %vm622_vm5, %v1400_v54 }
0x1669   :  { %v1571_v55 = vpop.permute.xlu1 %1570 }
0x166a   :  { %1574 = vst.msk [vmem:[#allocation4] sm:$0x3] %vm120_vm0, %v1571_v55  ;;  %1593 = vst.msk [vmem:[#allocation20] sm:$0x3] %vm120_vm0, %v1571_v55 }
0x166d   :  { %v1582_v56 = vpop.permute.xlu0 %1581 }
0x166e   :  { %1584 = vst.msk [vmem:[#allocation6] sm:$0x3] %vm120_vm0, %v1582_v56  ;;  %1594 = vst.msk [vmem:[#allocation21] sm:$0x3] %vm120_vm0, %v1582_v56 }
0x166f   :  { %v1566_v57 = vpop.permute.xlu1 %1565 }
0x1670   :  { %2236 = shalt.err (!%p2233_p2)
}
0x1671   :  { %s2237_s4 = scalar_lea.hbm %s3030_s11, 32 }
0x1672   :  { %p2238_p3 = scmp.ne.s32.totalorder %s3030_s11, %s2237_s4  ;;  %p2241_p4 = scmp.lt.u32.totalorder %s2237_s4, %s3030_s11 }
0x1674   :  { %p2243_p5 = pnand %p2241_p4, %p2238_p3 }
0x1676   :  { %2246 = shalt.err (!%p2243_p5)
}
0x1677   :  { %1644 = dma.vmem_to_hbm [thread:$0]  %s1642_s30, 32, %s3030_s11, [#allocation22]   ;;  %1568 = vst.msk [vmem:[#allocation18] sm:$0x1] %vm452_vm7, %v1566_v57  ;;  %v1558_v58 = vpop.permute.xlu0 %1557 }
0x1678   :  { %s2387_s0 = smov [#allocation23]   ;;  %s2247_s6 = scalar_lea.vmem %s2895_s27, 128 }
0x1679   :  { %s2916_s18 = sshll.u32 %s2387_s0, 4  ;;  %p2248_p6 = scmp.ne.s32.totalorder %s2895_s27, %s2247_s6  ;;  %s2981_s18 = int_to_ptr.vmem [resolvable:$true] %s2916_s18 }
0x167a   :  { %p2252_p7 = scmp.lt.s32.totalorder %s2895_s27, %s2895_s27  ;;  %p2253_p8 = scmp.lt.s32.totalorder %s2247_s6, %s2247_s6 }
0x167c   :  { %p2254_p9 = por %p2253_p8, %p2252_p7 }
0x167e   :  { %p2255_p10 = pnand %p2254_p9, %p2248_p6 }
0x1680   :  { %2258 = shalt.err (!%p2255_p10)
}
0x1681   :  { %s2259_s11 = scalar_lea.hbm %s3028_s9, 128 }
0x1682   :  { %p2260_p11 = scmp.ne.s32.totalorder %s3028_s9, %s2259_s11  ;;  %p2263_p12 = scmp.lt.u32.totalorder %s2259_s11, %s3028_s9 }
0x1684   :  { %p2265_p13 = pnand %p2263_p12, %p2260_p11 }
0x1686   :  { %2268 = shalt.err (!%p2265_p13)
}
0x1687   :  { %1624 = dma.vmem_to_hbm [thread:$0]  %s2895_s27, 128, %s3028_s9, [#allocation19], %s2373_s20, %s2373_s20, %s2374_s21   ;;  %1560 = vst.msk [vmem:[#allocation17 + $0x4] sm:$0x8] %vm462_vm4, %v1558_v58 }
0x1688   :  { %s2269_s22 = scalar_lea.vmem %s2901_s15, 32  ;;  %p2274_p1 = scmp.lt.s32.totalorder %s2901_s15, %s2901_s15 }
0x1689   :  { %p2270_p0 = scmp.ne.s32.totalorder %s2901_s15, %s2269_s22  ;;  %p2275_p2 = scmp.lt.s32.totalorder %s2269_s22, %s2269_s22 }
0x168b   :  { %p2276_p3 = por %p2275_p2, %p2274_p1 }
0x168d   :  { %p2277_p4 = pnand %p2276_p3, %p2270_p0 }
0x168f   :  { %2280 = shalt.err (!%p2277_p4)
}
0x1690   :  { %s2281_s19 = scalar_lea.hbm %s3029_s10, 32 }
0x1691   :  { %p2282_p5 = scmp.ne.s32.totalorder %s3029_s10, %s2281_s19  ;;  %p2285_p6 = scmp.lt.u32.totalorder %s2281_s19, %s3029_s10 }
0x1693   :  { %p2287_p7 = pnand %p2285_p6, %p2282_p5 }
0x1695   :  { %2290 = shalt.err (!%p2287_p7)
}
0x1696   :  { %1634 = dma.vmem_to_hbm [thread:$0]  %s2901_s15, 32, %s3029_s10, [#allocation19]   ;;  %v1587_v60 = vpop.permute.xlu1 %1586 }
0x1697   :  { %s2291_s0 = scalar_lea.vmem %s2899_s3, 128  ;;  %p2296_p9 = scmp.lt.s32.totalorder %s2899_s3, %s2899_s3 }
0x1698   :  { %p2292_p8 = scmp.ne.s32.totalorder %s2899_s3, %s2291_s0  ;;  %p2297_p10 = scmp.lt.s32.totalorder %s2291_s0, %s2291_s0 }
0x169a   :  { %p2298_p11 = por %p2297_p10, %p2296_p9 }
0x169c   :  { %p2299_p12 = pnand %p2298_p11, %p2292_p8 }
0x169e   :  { %2302 = shalt.err (!%p2299_p12)
}
0x169f   :  { %s2303_s29 = scalar_lea.hbm %s3027_s8, 128 }
0x16a0   :  { %p2304_p13 = scmp.ne.s32.totalorder %s3027_s8, %s2303_s29  ;;  %p2307_p0 = scmp.lt.u32.totalorder %s2303_s29, %s3027_s8 }
0x16a2   :  { %p2309_p1 = pnand %p2307_p0, %p2304_p13 }
0x16a4   :  { %2312 = shalt.err (!%p2309_p1)
}
0x16a5   :  { %1608 = dma.vmem_to_hbm [thread:$0]  %s2899_s3, 128, %s3027_s8, [#allocation10], %s2373_s20, %s2373_s20, %s2374_s21   ;;  %1589 = vst.msk [vmem:[#allocation7] sm:$0x3] %vm120_vm0, %v1587_v60  ;;  %1596 = vst.msk [vmem:[#allocation24] sm:$0x3] %vm120_vm0, %v1587_v60  ;;  %v1577_v61 = vpop.permute.xlu0 %1576 }
0x16a6   :  { %s2313_s16 = scalar_lea.vmem %s2918_s1, 32  ;;  %p2318_p3 = scmp.lt.s32.totalorder %s2918_s1, %s2918_s1 }
0x16a7   :  { %p2314_p2 = scmp.ne.s32.totalorder %s2918_s1, %s2313_s16  ;;  %p2319_p4 = scmp.lt.s32.totalorder %s2313_s16, %s2313_s16 }
0x16a9   :  { %p2320_p5 = por %p2319_p4, %p2318_p3 }
0x16ab   :  { %p2321_p6 = pnand %p2320_p5, %p2314_p2 }
0x16ad   :  { %2324 = shalt.err (!%p2321_p6)
}
0x16ae   :  { %s2325_s22 = scalar_lea.hbm %s3032_s13, 32 }
0x16af   :  { %p2326_p7 = scmp.ne.s32.totalorder %s3032_s13, %s2325_s22  ;;  %p2329_p8 = scmp.lt.u32.totalorder %s2325_s22, %s3032_s13 }
0x16b1   :  { %p2331_p9 = pnand %p2329_p8, %p2326_p7 }
0x16b3   :  { %2334 = shalt.err (!%p2331_p9)
}
0x16b4   :  { %1664 = dma.vmem_to_hbm [thread:$0]  %s2918_s1, 32, %s3032_s13, [#allocation25]   ;;  %1579 = vst.msk [vmem:[#allocation5] sm:$0x3] %vm120_vm0, %v1577_v61  ;;  %1595 = vst.msk [vmem:[#allocation23] sm:$0x3] %vm120_vm0, %v1577_v61 }
0x16b5   :  { %s2335_s19 = scalar_lea.vmem %s2981_s18, 32  ;;  %p2340_p11 = scmp.lt.s32.totalorder %s2981_s18, %s2981_s18 }
0x16b6   :  { %p2336_p10 = scmp.ne.s32.totalorder %s2981_s18, %s2335_s19  ;;  %p2341_p12 = scmp.lt.s32.totalorder %s2335_s19, %s2335_s19 }
0x16b8   :  { %p2342_p13 = por %p2341_p12, %p2340_p11 }
0x16ba   :  { %p2343_p0 = pnand %p2342_p13, %p2336_p10 }
0x16bc   :  { %2346 = shalt.err (!%p2343_p0)
}
0x16bd   :  { %s2347_s5 = scalar_lea.hbm %s3031_s12, 32 }
0x16be   :  { %p2348_p1 = scmp.ne.s32.totalorder %s3031_s12, %s2347_s5  ;;  %p2351_p2 = scmp.lt.u32.totalorder %s2347_s5, %s3031_s12 }
0x16c0   :  { %p2353_p3 = pnand %p2351_p2, %p2348_p1 }
0x16c2   :  { %2356 = shalt.err (!%p2353_p3)
}
0x16c3   :  { %1654 = dma.vmem_to_hbm [thread:$0]  %s2981_s18, 32, %s3031_s12, [#allocation22]  }
0x16c4   :  { %2363 = dma.done.wait [#allocation10], 128  }
0x16c5   :  { %2364 = vsyncadd [#allocation10], 4294967168 }
0x16c6   :  { %2365 = dma.done.wait [#allocation19], 160  }
0x16c7   :  { %2366 = vsyncadd [#allocation19], 4294967136 }
0x16c8   :  { %2367 = dma.done.wait [#allocation22], 64  }
0x16c9   :  { %2368 = vsyncadd [#allocation22], 4294967232 }
0x16ca   :  { %2369 = dma.done.wait [#allocation25], 32  }
0x16cb   :  { %2370 = vsyncadd [#allocation25], 4294967264 }
0x16cc   :  { %1683 = vsyncpa [#allocation9], 1 }
0x16cd   :  { %1684 = vsyncpa [#allocation12], 1 }
0x16ce   :  { %1685 = vsyncpa [#allocation15], 1 }
0x16cf   :  { %1686 = vsyncpa [#allocation10], 1 }
0x16d0   :  { %1687 = vsyncpa [#allocation19], 1 }
0x16d1   :  { %1688 = vsyncpa [#allocation22], 1 }
0x16d2   :  { %1689 = vsyncpa [#allocation25], 1 }

</bundles_post_ra>
